<compile_context>
chip_gen: v6e
topology: v6e:2x2x1
jax: 0.10.0
libtpu: 0.0.40
codegen_flags: <defaults>
</compile_context>

<pallas_src>
import functools

import jax
import jax.numpy as jnp
from jax.experimental import pallas as pl
from jax.experimental.pallas import tpu as pltpu

EXPANSION = 4
BN_EPS = 1e-5


def bottleneck_kernel(x_c_ref, x_top_ref, x_bot_ref,
                      w1_ref, b1_ref, w2_ref, b2_ref, w3_ref, b3_ref,
                      o_ref, pad_ref, *, TH, W, n_th):
    # x_c_ref  : (TH, W, Cin) bf16   current tile's input rows
    # x_top_ref: (W, Cin)     bf16   input row just above the tile (clamped)
    # x_bot_ref: (W, Cin)     bf16   input row just below the tile (clamped)
    # w1_ref: (Cin, P) bf16 (BN1 scale folded in);  b1_ref: (1, P) f32
    # w2_ref: (3, 3P, P) bf16, per-dx weights with dy stacked along K
    # w3_ref: (P, Cout) bf16;  b3_ref: (1, Cout) f32
    # o_ref : (TH, W, Cout) bf16
    # pad_ref: (TH+2, W+2, P) bf16 scratch (halo-padded conv2 input)
    t = pl.program_id(1)
    Cin = x_c_ref.shape[-1]
    P = w1_ref.shape[1]
    M = TH * W
    f32 = jnp.float32
    bf16 = jnp.bfloat16

    x_c = x_c_ref[...].reshape(M, Cin)                       # (M, Cin) bf16

    # ---- conv1 (1x1, BN scale folded) + shift + relu ----------------------
    def conv1(v):                                            # v: (rows, Cin) bf16
        h = jnp.dot(v, w1_ref[...], preferred_element_type=f32)
        return jnp.maximum(h + b1_ref[...], 0.0).astype(bf16)

    # Zero left/right halo columns (full height), then fill the rows.  Every
    # element conv2 reads is (re)written this step, so this is megacore-safe.
    pad_ref[:, 0:1, :] = jnp.zeros((TH + 2, 1, P), bf16)
    pad_ref[:, W + 1:W + 2, :] = jnp.zeros((TH + 2, 1, P), bf16)
    pad_ref[1:TH + 1, 1:W + 1, :] = conv1(x_c).reshape(TH, W, P)

    # Top / bottom 1-row halos: conv1 on the neighbouring input row, or zeros
    # at the image border (conv2's zero padding).
    @pl.when(t > 0)
    def _():
        pad_ref[0:1, 1:W + 1, :] = conv1(x_top_ref[...]).reshape(1, W, P)

    @pl.when(t == 0)
    def _():
        pad_ref[0:1, 1:W + 1, :] = jnp.zeros((1, W, P), bf16)

    @pl.when(t < n_th - 1)
    def _():
        pad_ref[TH + 1:TH + 2, 1:W + 1, :] = conv1(x_bot_ref[...]).reshape(1, W, P)

    @pl.when(t == n_th - 1)
    def _():
        pad_ref[TH + 1:TH + 2, 1:W + 1, :] = jnp.zeros((1, W, P), bf16)

    # ---- conv2 (3x3, BN scale folded): one K=3P matmul per dx -------------
    acc = None
    for dx in range(3):
        wsl = pad_ref[:, dx:dx + W, :]                       # (TH+2, W, P) bf16
        slab = jnp.concatenate(
            [wsl[0:TH], wsl[1:TH + 1], wsl[2:TH + 2]], axis=-1)  # (TH, W, 3P)
        mm = jnp.dot(slab.reshape(M, 3 * P), w2_ref[dx],
                     preferred_element_type=f32)             # (M, P) f32
        acc = mm if acc is None else acc + mm
    h2 = jnp.maximum(acc + b2_ref[...], 0.0).astype(bf16)    # bn2 fused here

    # ---- conv3 (1x1, BN scale folded) + shift + residual + relu -----------
    h3 = jnp.dot(h2, w3_ref[...], preferred_element_type=f32)   # (M, Cout) f32
    y = jnp.maximum(h3 + b3_ref[...] + x_c.astype(f32), 0.0)
    o_ref[...] = y.reshape(TH, W, -1).astype(o_ref.dtype)


def bottleneck_forward(x_nhwc, params, *, block_h=None):
    (w1, b1, w2f, b2, w3, b3) = params
    N, H, W, Cin = x_nhwc.shape
    P = w1.shape[1]
    Cout = w3.shape[1]
    assert Cout == Cin, "identity residual requires inplanes == planes*expansion"
    # TODO(synk): stride>1 / downsample branch not implemented in-kernel.

    if block_h is None:
        block_h = next(th for th in (32, 16, 8, 4, 2, 1) if H % th == 0)
    TH = block_h
    assert H % TH == 0, "block_h must divide H"
    n_th = H // TH

    xb = x_nhwc.astype(jnp.bfloat16)

    def _full(a):
        nd = a.ndim
        return pl.BlockSpec(a.shape, lambda n, t, _nd=nd: (0,) * _nd)

    # Explicit VMEM budget: double-buffered blocks + scratch + temp headroom.
    blk_in = TH * W * Cin * 2
    blk_halo = 2 * W * Cin * 2
    blk_out = TH * W * Cout * 2
    weights = (w1.size + w2f.size + w3.size) * 2 + (b1.size + b2.size + b3.size) * 4
    pad_bytes = (TH + 2) * (W + 2) * P * 2
    temps = 8 * TH * W * max(3 * P, Cout) * 4
    est = 2 * (blk_in + blk_halo + blk_out + weights) + pad_bytes + temps
    vmem_limit = int(min(64 * 1024 * 1024, max(32 * 1024 * 1024, 2 * est)))

    kernel = functools.partial(bottleneck_kernel, TH=TH, W=W, n_th=n_th)

    out = pl.pallas_call(
        kernel,
        out_shape=jax.ShapeDtypeStruct((N, H, W, Cout), jnp.bfloat16),
        grid_spec=pltpu.PrefetchScalarGridSpec(
            num_scalar_prefetch=0,
            grid=(N, n_th),
            in_specs=[
                # center rows of the tile
                pl.BlockSpec((None, TH, W, Cin), lambda n, t: (n, t, 0, 0)),
                # 1-row top halo (clamped at the image border, zero-overridden)
                pl.BlockSpec((None, None, W, Cin),
                             lambda n, t: (n, jnp.maximum(t * TH - 1, 0), 0, 0)),
                # 1-row bottom halo (clamped, zero-overridden)
                pl.BlockSpec((None, None, W, Cin),
                             lambda n, t: (n, jnp.minimum((t + 1) * TH, H - 1), 0, 0)),
                _full(w1), _full(b1), _full(w2f), _full(b2), _full(w3), _full(b3),
            ],
            out_specs=pl.BlockSpec((None, TH, W, Cout), lambda n, t: (n, t, 0, 0)),
            scratch_shapes=[pltpu.VMEM((TH + 2, W + 2, P), jnp.bfloat16)],
        ),
        compiler_params=pltpu.CompilerParams(
            dimension_semantics=("parallel", "parallel"),
            vmem_limit_bytes=vmem_limit),
    )(xb, xb, xb, w1, b1, w2f, b2, w3, b3)
    return out


def ref_forward(x_nhwc, params):
    """Pure-JAX reference using the SAME folded bf16 weights / f32 shifts."""
    (w1, b1, w2f, b2, w3, b3) = params
    Cin, P = w1.shape
    Cout = w3.shape[1]
    # Rebuild (kh, kw, in, out) 3x3 weights from the kernel's per-dx layout.
    w2_hwio = jnp.stack(
        [jnp.stack([w2f[dx, dy * P:(dy + 1) * P, :] for dx in range(3)], axis=0)
         for dy in range(3)], axis=0)                          # (3, 3, P, P)

    xb = x_nhwc.astype(jnp.bfloat16)

    def conv(x, w_hwio, pad):
        return jax.lax.conv_general_dilated(
            x, w_hwio, window_strides=(1, 1), padding=pad,
            dimension_numbers=('NHWC', 'HWIO', 'NHWC'),
            preferred_element_type=jnp.float32)

    h = jnp.maximum(conv(xb, w1.reshape(1, 1, Cin, P), [(0, 0), (0, 0)]) + b1, 0.0)
    h = jnp.maximum(conv(h.astype(jnp.bfloat16), w2_hwio, [(1, 1), (1, 1)]) + b2, 0.0)
    h = conv(h.astype(jnp.bfloat16), w3.reshape(1, 1, P, Cout), [(0, 0), (0, 0)]) + b3
    return jnp.maximum(h + xb.astype(jnp.float32), 0.0)


def make_params(key, inplanes, planes):
    """PyTorch-layout conv weights + BN stats, folded for the kernel."""
    cout = planes * EXPANSION
    ks = jax.random.split(key, 15)

    w1_t = jax.random.normal(ks[0], (planes, inplanes, 1, 1), jnp.float32) * 0.1
    w2_t = jax.random.normal(ks[1], (planes, planes, 3, 3), jnp.float32) * 0.1
    w3_t = jax.random.normal(ks[2], (cout, planes, 1, 1), jnp.float32) * 0.1

    def bn(kg, kb, km, kv, c):
        gamma = 1.0 + 0.1 * jax.random.normal(kg, (c,), jnp.float32)
        beta = 0.1 * jax.random.normal(kb, (c,), jnp.float32)
        mean = 0.1 * jax.random.normal(km, (c,), jnp.float32)
        var = jax.random.uniform(kv, (c,), jnp.float32, minval=0.5, maxval=1.5)
        scale = gamma / jnp.sqrt(var + BN_EPS)
        shift = beta - mean * scale
        return scale, shift

    s1, sh1 = bn(ks[3], ks[4], ks[5], ks[6], planes)
    s2, sh2 = bn(ks[7], ks[8], ks[9], ks[10], planes)
    s3, sh3 = bn(ks[11], ks[12], ks[13], ks[14], cout)

    # Fold BN scale into the conv weights (exact for eval-mode BN); keep the
    # per-channel shift as an f32 add before each ReLU.
    w1 = (w1_t[:, :, 0, 0].T * s1).astype(jnp.bfloat16)                  # (Cin, P)
    w2_hwio = (jnp.transpose(w2_t, (2, 3, 1, 0)) * s2).astype(jnp.bfloat16)  # (3,3,P,P)
    w2f = jnp.stack([w2_hwio[:, dx].reshape(3 * planes, planes)
                     for dx in range(3)], axis=0)                        # (3, 3P, P)
    w3 = (w3_t[:, :, 0, 0].T * s3).astype(jnp.bfloat16)                  # (P, Cout)

    b1 = sh1.reshape(1, planes).astype(jnp.float32)
    b2 = sh2.reshape(1, planes).astype(jnp.float32)
    b3 = sh3.reshape(1, cout).astype(jnp.float32)
    return (w1, b1, w2f, b2, w3, b3)


if __name__ == "__main__":
    key = jax.random.PRNGKey(0)
    k_x, k_p = jax.random.split(key)

    # Small shapes: batch=2, planes=8 -> inplanes = Cout = 32, spatial 8x8.
    N, H, W = 2, 8, 8
    planes = 8
    inplanes = planes * EXPANSION   # identity residual (no downsample)

    x_nchw = jax.random.normal(k_x, (N, inplanes, H, W), jnp.float32)
    x_nhwc = jnp.transpose(x_nchw, (0, 2, 3, 1))
    params = make_params(k_p, inplanes, planes)

    # block_h=4 -> two H-tiles per image, exercising both halo code paths.
    out = jax.block_until_ready(bottleneck_forward(x_nhwc, params, block_h=4))
    ref = jax.block_until_ready(ref_forward(x_nhwc, params))

    assert out.shape == (N, H, W, planes * EXPANSION)
    assert out.dtype == jnp.bfloat16
    out_f32 = out.astype(jnp.float32)
    err = float(jnp.max(jnp.abs(out_f32 - ref)))
    assert jnp.allclose(out_f32, ref, rtol=2e-2, atol=2e-2), f"mismatch {err}"

    print("KERNEL_OK")
</pallas_src>

<mosaic_0001>
module attributes {stable_mosaic.version = 11 : i64} {
  func.func @bottleneck_kernel(%arg0: i32, %arg1: i32, %arg2: memref<1x4x8x32xbf16, #tpu.memory_space<vmem>>, %arg3: memref<1x1x8x32xbf16, #tpu.memory_space<vmem>>, %arg4: memref<1x1x8x32xbf16, #tpu.memory_space<vmem>>, %arg5: memref<32x8xbf16, #tpu.memory_space<vmem>>, %arg6: memref<1x8xf32, #tpu.memory_space<vmem>>, %arg7: memref<3x24x8xbf16, #tpu.memory_space<vmem>>, %arg8: memref<1x8xf32, #tpu.memory_space<vmem>>, %arg9: memref<8x32xbf16, #tpu.memory_space<vmem>>, %arg10: memref<1x32xf32, #tpu.memory_space<vmem>>, %arg11: memref<1x4x8x32xbf16, #tpu.memory_space<vmem>>, %arg12: memref<6x10x8xbf16, #tpu.memory_space<vmem>>) attributes {dimension_semantics = [#tpu.dimension_semantics<parallel>, #tpu.dimension_semantics<parallel>], iteration_bounds = array<i64: 2, 2>, scalar_prefetch = 0 : i64, scratch_operands = 1 : i64, tpu.core_type = #tpu.core_type<tc>, window_params = [{transform_indices = @transform_0, window_bounds = array<i64: 1, 4, 8, 32>}, {transform_indices = @transform_1, window_bounds = array<i64: 1, 1, 8, 32>}, {transform_indices = @transform_2, window_bounds = array<i64: 1, 1, 8, 32>}, {pipeline_mode = #tpu.pipeline_mode<synchronous>, transform_indices = @transform_3, window_bounds = array<i64: 32, 8>}, {pipeline_mode = #tpu.pipeline_mode<synchronous>, transform_indices = @transform_4, window_bounds = array<i64: 1, 8>}, {pipeline_mode = #tpu.pipeline_mode<synchronous>, transform_indices = @transform_5, window_bounds = array<i64: 3, 24, 8>}, {pipeline_mode = #tpu.pipeline_mode<synchronous>, transform_indices = @transform_6, window_bounds = array<i64: 1, 8>}, {pipeline_mode = #tpu.pipeline_mode<synchronous>, transform_indices = @transform_7, window_bounds = array<i64: 8, 32>}, {pipeline_mode = #tpu.pipeline_mode<synchronous>, transform_indices = @transform_8, window_bounds = array<i64: 1, 32>}, {transform_indices = @transform_9, window_bounds = array<i64: 1, 4, 8, 32>}]} {
    %c0 = arith.constant 0 : index
    %c0_0 = arith.constant 0 : index
    %c0_1 = arith.constant 0 : index
    %c0_2 = arith.constant 0 : index
    %0 = vector.load %arg2[%c0, %c0_0, %c0_1, %c0_2] : memref<1x4x8x32xbf16, #tpu.memory_space<vmem>>, vector<1x4x8x32xbf16>
    %1 = vector.shape_cast %0 : vector<1x4x8x32xbf16> to vector<4x8x32xbf16>
    %2 = vector.shape_cast %1 : vector<4x8x32xbf16> to vector<32x32xbf16>
    %cst = arith.constant 0.000000e+00 : bf16
    %3 = vector.broadcast %cst : bf16 to vector<6x1x8xbf16>
    %c0_3 = arith.constant 0 : index
    %c0_4 = arith.constant 0 : index
    %c0_5 = arith.constant 0 : index
    %4 = vector.load %arg12[%c0_3, %c0_4, %c0_5] : memref<6x10x8xbf16, #tpu.memory_space<vmem>>, vector<6x1x8xbf16>
    tpu.vector_store %arg12[%c0_3, %c0_4, %c0_5], %3 {strides = array<i32>} : memref<6x10x8xbf16, #tpu.memory_space<vmem>>, vector<6x1x8xbf16>,
    %cst_6 = arith.constant 0.000000e+00 : bf16
    %5 = vector.broadcast %cst_6 : bf16 to vector<6x1x8xbf16>
    %c0_7 = arith.constant 0 : index
    %c9 = arith.constant 9 : index
    %c0_8 = arith.constant 0 : index
    %6 = vector.load %arg12[%c0_7, %c9, %c0_8] : memref<6x10x8xbf16, #tpu.memory_space<vmem>>, vector<6x1x8xbf16>
    tpu.vector_store %arg12[%c0_7, %c9, %c0_8], %5 {strides = array<i32>} : memref<6x10x8xbf16, #tpu.memory_space<vmem>>, vector<6x1x8xbf16>,
    %c0_9 = arith.constant 0 : index
    %c0_10 = arith.constant 0 : index
    %7 = vector.load %arg5[%c0_9, %c0_10] : memref<32x8xbf16, #tpu.memory_space<vmem>>, vector<32x8xbf16>
    %cst_11 = arith.constant dense<0.000000e+00> : vector<32x8xf32>
    %8 = tpu.matmul %2, %7, %cst_11 {dimension_numbers = #tpu.dot_dimension_numbers<[1], [0], [0], [1], [0, 0, 1, 1], [], []>} : vector<32x32xbf16>, vector<32x8xbf16>, vector<32x8xf32> -> vector<32x8xf32>
    %c0_12 = arith.constant 0 : index
    %c0_13 = arith.constant 0 : index
    %9 = vector.load %arg6[%c0_12, %c0_13] : memref<1x8xf32, #tpu.memory_space<vmem>>, vector<1x8xf32>
    %10 = vector.broadcast %9 : vector<1x8xf32> to vector<32x8xf32>
    %11 = arith.addf %8, %10 : vector<32x8xf32>
    %cst_14 = arith.constant 0.000000e+00 : f32
    %12 = vector.broadcast %cst_14 : f32 to vector<32x8xf32>
    %13 = arith.maximumf %11, %12 : vector<32x8xf32>
    %14 = arith.truncf %13 : vector<32x8xf32> to vector<32x8xbf16>
    %15 = vector.shape_cast %14 : vector<32x8xbf16> to vector<4x8x8xbf16>
    %c1 = arith.constant 1 : index
    %c1_15 = arith.constant 1 : index
    %c0_16 = arith.constant 0 : index
    %16 = vector.load %arg12[%c1, %c1_15, %c0_16] : memref<6x10x8xbf16, #tpu.memory_space<vmem>>, vector<4x8x8xbf16>
    tpu.vector_store %arg12[%c1, %c1_15, %c0_16], %15 {strides = array<i32>} : memref<6x10x8xbf16, #tpu.memory_space<vmem>>, vector<4x8x8xbf16>,
    %c0_i32 = arith.constant 0 : i32
    %17 = arith.cmpi sgt, %arg1, %c0_i32 : i32
    %18 = arith.extui %17 : i1 to i32
    %c0_i32_17 = arith.constant 0 : i32
    %19 = arith.cmpi ne, %18, %c0_i32_17 : i32
    scf.if %19 {
      %c0_56 = arith.constant 0 : index
      %c0_57 = arith.constant 0 : index
      %c0_58 = arith.constant 0 : index
      %c0_59 = arith.constant 0 : index
      %78 = vector.load %arg3[%c0_56, %c0_57, %c0_58, %c0_59] : memref<1x1x8x32xbf16, #tpu.memory_space<vmem>>, vector<1x1x8x32xbf16>
      %79 = vector.shape_cast %78 : vector<1x1x8x32xbf16> to vector<8x32xbf16>
      %c0_60 = arith.constant 0 : index
      %c0_61 = arith.constant 0 : index
      %80 = vector.load %arg5[%c0_60, %c0_61] : memref<32x8xbf16, #tpu.memory_space<vmem>>, vector<32x8xbf16>
      %cst_62 = arith.constant dense<0.000000e+00> : vector<8x8xf32>
      %81 = tpu.matmul %79, %80, %cst_62 {dimension_numbers = #tpu.dot_dimension_numbers<[1], [0], [0], [1], [0, 0, 1, 1], [], []>} : vector<8x32xbf16>, vector<32x8xbf16>, vector<8x8xf32> -> vector<8x8xf32>
      %c0_63 = arith.constant 0 : index
      %c0_64 = arith.constant 0 : index
      %82 = vector.load %arg6[%c0_63, %c0_64] : memref<1x8xf32, #tpu.memory_space<vmem>>, vector<1x8xf32>
      %83 = vector.broadcast %82 : vector<1x8xf32> to vector<8x8xf32>
      %84 = arith.addf %81, %83 : vector<8x8xf32>
      %cst_65 = arith.constant 0.000000e+00 : f32
      %85 = vector.broadcast %cst_65 : f32 to vector<8x8xf32>
      %86 = arith.maximumf %84, %85 : vector<8x8xf32>
      %87 = arith.truncf %86 : vector<8x8xf32> to vector<8x8xbf16>
      %88 = vector.shape_cast %87 : vector<8x8xbf16> to vector<1x8x8xbf16>
      %c0_66 = arith.constant 0 : index
      %c1_67 = arith.constant 1 : index
      %c0_68 = arith.constant 0 : index
      %89 = vector.load %arg12[%c0_66, %c1_67, %c0_68] : memref<6x10x8xbf16, #tpu.memory_space<vmem>>, vector<1x8x8xbf16>
      tpu.vector_store %arg12[%c0_66, %c1_67, %c0_68], %88 {strides = array<i32>} : memref<6x10x8xbf16, #tpu.memory_space<vmem>>, vector<1x8x8xbf16>,
    } else {
    }
    %c0_i32_18 = arith.constant 0 : i32
    %20 = arith.cmpi eq, %arg1, %c0_i32_18 : i32
    %21 = arith.extui %20 : i1 to i32
    %c0_i32_19 = arith.constant 0 : i32
    %22 = arith.cmpi ne, %21, %c0_i32_19 : i32
    scf.if %22 {
      %cst_56 = arith.constant 0.000000e+00 : bf16
      %78 = vector.broadcast %cst_56 : bf16 to vector<1x8x8xbf16>
      %c0_57 = arith.constant 0 : index
      %c1_58 = arith.constant 1 : index
      %c0_59 = arith.constant 0 : index
      %79 = vector.load %arg12[%c0_57, %c1_58, %c0_59] : memref<6x10x8xbf16, #tpu.memory_space<vmem>>, vector<1x8x8xbf16>
      tpu.vector_store %arg12[%c0_57, %c1_58, %c0_59], %78 {strides = array<i32>} : memref<6x10x8xbf16, #tpu.memory_space<vmem>>, vector<1x8x8xbf16>,
    } else {
    }
    %c1_i32 = arith.constant 1 : i32
    %23 = arith.cmpi slt, %arg1, %c1_i32 : i32
    %24 = arith.extui %23 : i1 to i32
    %c0_i32_20 = arith.constant 0 : i32
    %25 = arith.cmpi ne, %24, %c0_i32_20 : i32
    scf.if %25 {
      %c0_56 = arith.constant 0 : index
      %c0_57 = arith.constant 0 : index
      %c0_58 = arith.constant 0 : index
      %c0_59 = arith.constant 0 : index
      %78 = vector.load %arg4[%c0_56, %c0_57, %c0_58, %c0_59] : memref<1x1x8x32xbf16, #tpu.memory_space<vmem>>, vector<1x1x8x32xbf16>
      %79 = vector.shape_cast %78 : vector<1x1x8x32xbf16> to vector<8x32xbf16>
      %c0_60 = arith.constant 0 : index
      %c0_61 = arith.constant 0 : index
      %80 = vector.load %arg5[%c0_60, %c0_61] : memref<32x8xbf16, #tpu.memory_space<vmem>>, vector<32x8xbf16>
      %cst_62 = arith.constant dense<0.000000e+00> : vector<8x8xf32>
      %81 = tpu.matmul %79, %80, %cst_62 {dimension_numbers = #tpu.dot_dimension_numbers<[1], [0], [0], [1], [0, 0, 1, 1], [], []>} : vector<8x32xbf16>, vector<32x8xbf16>, vector<8x8xf32> -> vector<8x8xf32>
      %c0_63 = arith.constant 0 : index
      %c0_64 = arith.constant 0 : index
      %82 = vector.load %arg6[%c0_63, %c0_64] : memref<1x8xf32, #tpu.memory_space<vmem>>, vector<1x8xf32>
      %83 = vector.broadcast %82 : vector<1x8xf32> to vector<8x8xf32>
      %84 = arith.addf %81, %83 : vector<8x8xf32>
      %cst_65 = arith.constant 0.000000e+00 : f32
      %85 = vector.broadcast %cst_65 : f32 to vector<8x8xf32>
      %86 = arith.maximumf %84, %85 : vector<8x8xf32>
      %87 = arith.truncf %86 : vector<8x8xf32> to vector<8x8xbf16>
      %88 = vector.shape_cast %87 : vector<8x8xbf16> to vector<1x8x8xbf16>
      %c5 = arith.constant 5 : index
      %c1_66 = arith.constant 1 : index
      %c0_67 = arith.constant 0 : index
      %89 = vector.load %arg12[%c5, %c1_66, %c0_67] : memref<6x10x8xbf16, #tpu.memory_space<vmem>>, vector<1x8x8xbf16>
      tpu.vector_store %arg12[%c5, %c1_66, %c0_67], %88 {strides = array<i32>} : memref<6x10x8xbf16, #tpu.memory_space<vmem>>, vector<1x8x8xbf16>,
    } else {
    }
    %c1_i32_21 = arith.constant 1 : i32
    %26 = arith.cmpi eq, %arg1, %c1_i32_21 : i32
    %27 = arith.extui %26 : i1 to i32
    %c0_i32_22 = arith.constant 0 : i32
    %28 = arith.cmpi ne, %27, %c0_i32_22 : i32
    scf.if %28 {
      %cst_56 = arith.constant 0.000000e+00 : bf16
      %78 = vector.broadcast %cst_56 : bf16 to vector<1x8x8xbf16>
      %c5 = arith.constant 5 : index
      %c1_57 = arith.constant 1 : index
      %c0_58 = arith.constant 0 : index
      %79 = vector.load %arg12[%c5, %c1_57, %c0_58] : memref<6x10x8xbf16, #tpu.memory_space<vmem>>, vector<1x8x8xbf16>
      tpu.vector_store %arg12[%c5, %c1_57, %c0_58], %78 {strides = array<i32>} : memref<6x10x8xbf16, #tpu.memory_space<vmem>>, vector<1x8x8xbf16>,
    } else {
    }
    %c0_23 = arith.constant 0 : index
    %c0_24 = arith.constant 0 : index
    %c0_25 = arith.constant 0 : index
    %29 = vector.load %arg12[%c0_23, %c0_24, %c0_25] : memref<6x10x8xbf16, #tpu.memory_space<vmem>>, vector<6x8x8xbf16>
    %30 = vector.extract_strided_slice %29 {offsets = [0, 0, 0], sizes = [4, 8, 8], strides = [1, 1, 1]} : vector<6x8x8xbf16> to vector<4x8x8xbf16>
    %31 = vector.extract_strided_slice %29 {offsets = [1, 0, 0], sizes = [4, 8, 8], strides = [1, 1, 1]} : vector<6x8x8xbf16> to vector<4x8x8xbf16>
    %32 = vector.extract_strided_slice %29 {offsets = [2, 0, 0], sizes = [4, 8, 8], strides = [1, 1, 1]} : vector<6x8x8xbf16> to vector<4x8x8xbf16>
    %33 = tpu.concatenate %30, %31, %32 in 2 : vector<4x8x8xbf16>, vector<4x8x8xbf16>, vector<4x8x8xbf16> -> vector<4x8x24xbf16>
    %34 = vector.shape_cast %33 : vector<4x8x24xbf16> to vector<32x24xbf16>
    %c0_26 = arith.constant 0 : index
    %c0_27 = arith.constant 0 : index
    %c0_28 = arith.constant 0 : index
    %35 = vector.load %arg7[%c0_26, %c0_27, %c0_28] : memref<3x24x8xbf16, #tpu.memory_space<vmem>>, vector<1x24x8xbf16>
    %36 = vector.shape_cast %35 : vector<1x24x8xbf16> to vector<24x8xbf16>
    %cst_29 = arith.constant dense<0.000000e+00> : vector<32x8xf32>
    %37 = tpu.matmul %34, %36, %cst_29 {dimension_numbers = #tpu.dot_dimension_numbers<[1], [0], [0], [1], [0, 0, 1, 1], [], []>} : vector<32x24xbf16>, vector<24x8xbf16>, vector<32x8xf32> -> vector<32x8xf32>
    %c0_30 = arith.constant 0 : index
    %c1_31 = arith.constant 1 : index
    %c0_32 = arith.constant 0 : index
    %38 = vector.load %arg12[%c0_30, %c1_31, %c0_32] : memref<6x10x8xbf16, #tpu.memory_space<vmem>>, vector<6x8x8xbf16>
    %39 = vector.extract_strided_slice %38 {offsets = [0, 0, 0], sizes = [4, 8, 8], strides = [1, 1, 1]} : vector<6x8x8xbf16> to vector<4x8x8xbf16>
    %40 = vector.extract_strided_slice %38 {offsets = [1, 0, 0], sizes = [4, 8, 8], strides = [1, 1, 1]} : vector<6x8x8xbf16> to vector<4x8x8xbf16>
    %41 = vector.extract_strided_slice %38 {offsets = [2, 0, 0], sizes = [4, 8, 8], strides = [1, 1, 1]} : vector<6x8x8xbf16> to vector<4x8x8xbf16>
    %42 = tpu.concatenate %39, %40, %41 in 2 : vector<4x8x8xbf16>, vector<4x8x8xbf16>, vector<4x8x8xbf16> -> vector<4x8x24xbf16>
    %43 = vector.shape_cast %42 : vector<4x8x24xbf16> to vector<32x24xbf16>
    %c1_33 = arith.constant 1 : index
    %c0_34 = arith.constant 0 : index
    %c0_35 = arith.constant 0 : index
    %44 = vector.load %arg7[%c1_33, %c0_34, %c0_35] : memref<3x24x8xbf16, #tpu.memory_space<vmem>>, vector<1x24x8xbf16>
    %45 = vector.shape_cast %44 : vector<1x24x8xbf16> to vector<24x8xbf16>
    %cst_36 = arith.constant dense<0.000000e+00> : vector<32x8xf32>
    %46 = tpu.matmul %43, %45, %cst_36 {dimension_numbers = #tpu.dot_dimension_numbers<[1], [0], [0], [1], [0, 0, 1, 1], [], []>} : vector<32x24xbf16>, vector<24x8xbf16>, vector<32x8xf32> -> vector<32x8xf32>
    %47 = arith.addf %37, %46 : vector<32x8xf32>
    %c0_37 = arith.constant 0 : index
    %c2 = arith.constant 2 : index
    %c0_38 = arith.constant 0 : index
    %48 = vector.load %arg12[%c0_37, %c2, %c0_38] : memref<6x10x8xbf16, #tpu.memory_space<vmem>>, vector<6x8x8xbf16>
    %49 = vector.extract_strided_slice %48 {offsets = [0, 0, 0], sizes = [4, 8, 8], strides = [1, 1, 1]} : vector<6x8x8xbf16> to vector<4x8x8xbf16>
    %50 = vector.extract_strided_slice %48 {offsets = [1, 0, 0], sizes = [4, 8, 8], strides = [1, 1, 1]} : vector<6x8x8xbf16> to vector<4x8x8xbf16>
    %51 = vector.extract_strided_slice %48 {offsets = [2, 0, 0], sizes = [4, 8, 8], strides = [1, 1, 1]} : vector<6x8x8xbf16> to vector<4x8x8xbf16>
    %52 = tpu.concatenate %49, %50, %51 in 2 : vector<4x8x8xbf16>, vector<4x8x8xbf16>, vector<4x8x8xbf16> -> vector<4x8x24xbf16>
    %53 = vector.shape_cast %52 : vector<4x8x24xbf16> to vector<32x24xbf16>
    %c2_39 = arith.constant 2 : index
    %c0_40 = arith.constant 0 : index
    %c0_41 = arith.constant 0 : index
    %54 = vector.load %arg7[%c2_39, %c0_40, %c0_41] : memref<3x24x8xbf16, #tpu.memory_space<vmem>>, vector<1x24x8xbf16>
    %55 = vector.shape_cast %54 : vector<1x24x8xbf16> to vector<24x8xbf16>
    %cst_42 = arith.constant dense<0.000000e+00> : vector<32x8xf32>
    %56 = tpu.matmul %53, %55, %cst_42 {dimension_numbers = #tpu.dot_dimension_numbers<[1], [0], [0], [1], [0, 0, 1, 1], [], []>} : vector<32x24xbf16>, vector<24x8xbf16>, vector<32x8xf32> -> vector<32x8xf32>
    %57 = arith.addf %47, %56 : vector<32x8xf32>
    %c0_43 = arith.constant 0 : index
    %c0_44 = arith.constant 0 : index
    %58 = vector.load %arg8[%c0_43, %c0_44] : memref<1x8xf32, #tpu.memory_space<vmem>>, vector<1x8xf32>
    %59 = vector.broadcast %58 : vector<1x8xf32> to vector<32x8xf32>
    %60 = arith.addf %57, %59 : vector<32x8xf32>
    %cst_45 = arith.constant 0.000000e+00 : f32
    %61 = vector.broadcast %cst_45 : f32 to vector<32x8xf32>
    %62 = arith.maximumf %60, %61 : vector<32x8xf32>
    %63 = arith.truncf %62 : vector<32x8xf32> to vector<32x8xbf16>
    %c0_46 = arith.constant 0 : index
    %c0_47 = arith.constant 0 : index
    %64 = vector.load %arg9[%c0_46, %c0_47] : memref<8x32xbf16, #tpu.memory_space<vmem>>, vector<8x32xbf16>
    %cst_48 = arith.constant dense<0.000000e+00> : vector<32x32xf32>
    %65 = tpu.matmul %63, %64, %cst_48 {dimension_numbers = #tpu.dot_dimension_numbers<[1], [0], [0], [1], [0, 0, 1, 1], [], []>} : vector<32x8xbf16>, vector<8x32xbf16>, vector<32x32xf32> -> vector<32x32xf32>
    %c0_49 = arith.constant 0 : index
    %c0_50 = arith.constant 0 : index
    %66 = vector.load %arg10[%c0_49, %c0_50] : memref<1x32xf32, #tpu.memory_space<vmem>>, vector<1x32xf32>
    %67 = vector.broadcast %66 : vector<1x32xf32> to vector<32x32xf32>
    %68 = arith.addf %65, %67 : vector<32x32xf32>
    %69 = arith.extf %2 : vector<32x32xbf16> to vector<32x32xf32>
    %70 = arith.addf %68, %69 : vector<32x32xf32>
    %cst_51 = arith.constant 0.000000e+00 : f32
    %71 = vector.broadcast %cst_51 : f32 to vector<32x32xf32>
    %72 = arith.maximumf %70, %71 : vector<32x32xf32>
    %73 = vector.shape_cast %72 : vector<32x32xf32> to vector<4x8x32xf32>
    %74 = arith.truncf %73 : vector<4x8x32xf32> to vector<4x8x32xbf16>
    %c0_52 = arith.constant 0 : index
    %c0_53 = arith.constant 0 : index
    %c0_54 = arith.constant 0 : index
    %c0_55 = arith.constant 0 : index
    %75 = vector.load %arg11[%c0_52, %c0_53, %c0_54, %c0_55] : memref<1x4x8x32xbf16, #tpu.memory_space<vmem>>, vector<1x4x8x32xbf16>
    %76 = vector.shape_cast %75 : vector<1x4x8x32xbf16> to vector<4x8x32xbf16>
    %77 = vector.shape_cast %74 : vector<4x8x32xbf16> to vector<1x4x8x32xbf16>
    tpu.vector_store %arg11[%c0_52, %c0_53, %c0_54, %c0_55], %77 {strides = array<i32>} : memref<1x4x8x32xbf16, #tpu.memory_space<vmem>>, vector<1x4x8x32xbf16>,
    return
  }
  func.func @transform_0(%arg0: i32, %arg1: i32) -> (i32, i32, i32, i32) {
    %c0_i32 = arith.constant 0 : i32
    %c0_i32_0 = arith.constant 0 : i32
    %c0_i32_1 = arith.constant 0 : i32
    return %arg0, %arg1, %c0_i32, %c0_i32_0 : i32, i32, i32, i32
  }
  func.func @transform_1(%arg0: i32, %arg1: i32) -> (i32, i32, i32, i32) {
    %c4_i32 = arith.constant 4 : i32
    %0 = arith.muli %arg1, %c4_i32 : i32
    %c1_i32 = arith.constant 1 : i32
    %1 = arith.subi %0, %c1_i32 : i32
    %c0_i32 = arith.constant 0 : i32
    %2 = arith.maxsi %1, %c0_i32 : i32
    %c0_i32_0 = arith.constant 0 : i32
    %c0_i32_1 = arith.constant 0 : i32
    %c0_i32_2 = arith.constant 0 : i32
    return %arg0, %2, %c0_i32_0, %c0_i32_1 : i32, i32, i32, i32
  }
  func.func @transform_2(%arg0: i32, %arg1: i32) -> (i32, i32, i32, i32) {
    %c1_i32 = arith.constant 1 : i32
    %0 = arith.addi %arg1, %c1_i32 : i32
    %c4_i32 = arith.constant 4 : i32
    %1 = arith.muli %0, %c4_i32 : i32
    %c7_i32 = arith.constant 7 : i32
    %2 = arith.minsi %1, %c7_i32 : i32
    %c0_i32 = arith.constant 0 : i32
    %c0_i32_0 = arith.constant 0 : i32
    %c0_i32_1 = arith.constant 0 : i32
    return %arg0, %2, %c0_i32, %c0_i32_0 : i32, i32, i32, i32
  }
  func.func @transform_3(%arg0: i32, %arg1: i32) -> (i32, i32) {
    %c0_i32 = arith.constant 0 : i32
    %c0_i32_0 = arith.constant 0 : i32
    %c0_i32_1 = arith.constant 0 : i32
    return %c0_i32, %c0_i32_0 : i32, i32
  }
  func.func @transform_4(%arg0: i32, %arg1: i32) -> (i32, i32) {
    %c0_i32 = arith.constant 0 : i32
    %c0_i32_0 = arith.constant 0 : i32
    %c0_i32_1 = arith.constant 0 : i32
    return %c0_i32, %c0_i32_0 : i32, i32
  }
  func.func @transform_5(%arg0: i32, %arg1: i32) -> (i32, i32, i32) {
    %c0_i32 = arith.constant 0 : i32
    %c0_i32_0 = arith.constant 0 : i32
    %c0_i32_1 = arith.constant 0 : i32
    %c0_i32_2 = arith.constant 0 : i32
    return %c0_i32, %c0_i32_0, %c0_i32_1 : i32, i32, i32
  }
  func.func @transform_6(%arg0: i32, %arg1: i32) -> (i32, i32) {
    %c0_i32 = arith.constant 0 : i32
    %c0_i32_0 = arith.constant 0 : i32
    %c0_i32_1 = arith.constant 0 : i32
    return %c0_i32, %c0_i32_0 : i32, i32
  }
  func.func @transform_7(%arg0: i32, %arg1: i32) -> (i32, i32) {
    %c0_i32 = arith.constant 0 : i32
    %c0_i32_0 = arith.constant 0 : i32
    %c0_i32_1 = arith.constant 0 : i32
    return %c0_i32, %c0_i32_0 : i32, i32
  }
  func.func @transform_8(%arg0: i32, %arg1: i32) -> (i32, i32) {
    %c0_i32 = arith.constant 0 : i32
    %c0_i32_0 = arith.constant 0 : i32
    %c0_i32_1 = arith.constant 0 : i32
    return %c0_i32, %c0_i32_0 : i32, i32
  }
  func.func @transform_9(%arg0: i32, %arg1: i32) -> (i32, i32, i32, i32) {
    %c0_i32 = arith.constant 0 : i32
    %c0_i32_0 = arith.constant 0 : i32
    %c0_i32_1 = arith.constant 0 : i32
    return %arg0, %arg1, %c0_i32, %c0_i32_0 : i32, i32, i32, i32
  }
}

</mosaic_0001>

<bundles_post_ra>
// kernel: tpu_custom_call.1
= control target key start
LH: loop header
LB: loop body
LE: loop exit
PB: predicated region body
PF: predicated region fallthrough
CT: control target
= control target key end

     0   :  { %s3115_s0 = inlined_call_operand.vmem [shape: bf16[2,8,8,32], index: 0, kind: input, shape index: {}]   ;;  %s3116_s1 = inlined_call_operand.hbm [shape: bf16[2,8,8,32], index: 1, kind: input, shape index: {}]   ;;  %s3117_s2 = inlined_call_operand.hbm [shape: bf16[2,8,8,32], index: 2, kind: input, shape index: {}]   ;;  %s3118_s3 = inlined_call_operand.vmem [shape: bf16[32,8], index: 3, kind: input, shape index: {}]   ;;  %s3119_s4 = inlined_call_operand.hbm [shape: f32[1,8], index: 4, kind: input, shape index: {}]   ;;  %s3120_s5 = inlined_call_operand.vmem [shape: bf16[3,24,8], index: 5, kind: input, shape index: {}]   ;;  %s3121_s6 = inlined_call_operand.hbm [shape: f32[1,8], index: 6, kind: input, shape index: {}]   ;;  %s3122_s7 = inlined_call_operand.vmem [shape: bf16[8,32], index: 7, kind: input, shape index: {}]   ;;  %s3123_s8 = inlined_call_operand.vmem [shape: f32[1,32], index: 8, kind: input, shape index: {}]   ;;  %s3124_s9 = inlined_call_operand.hbm [shape: bf16[2,8,8,32], index: 9, kind: output, shape index: {}]  }
   0x1   :  { %3147 = sst [smem:[#allocation28_spill]] %s3115_s0 }
   0x2   :  { %3148 = sst [smem:[#allocation29_spill]] %s3118_s3 }
   0x3   :  { %3149 = sst [smem:[#allocation30_spill]] %s3119_s4 }
   0x4   :  { %3150 = sst [smem:[#allocation31_spill]] %s3120_s5 }
   0x5   :  { %3151 = sst [smem:[#allocation32_spill]] %s3121_s6 }
   0x6   :  { %3152 = sst [smem:[#allocation33_spill]] %s3122_s7 }
   0x7   :  { %3153 = sst [smem:[#allocation34_spill]] %s3123_s8 }
   0x8   :  { %3154 = sst [smem:[#allocation35_spill]] %s3124_s9 }
   0x9   :  { %14 = vsyncpa [#allocation4], 0 }
   0xa   :  { %16 = vsyncpa [#allocation4 + $0x1], 0 }
   0xb   :  { %17 = vsyncpa [#allocation7], 0 }
   0xc   :  { %19 = vsyncpa [#allocation7 + $0x1], 0 }
   0xd   :  { %20 = vsyncpa [#allocation10], 0 }
   0xe   :  { %21 = vsyncpa [#allocation5], 0 }
   0xf   :  { %23 = vsyncpa [#allocation5 + $0x1], 0  ;;  %s2478_s30 = smov 0   ;;  %s2480_s10 = smov 0  }
  0x10   :  { %s2482_s11 = smov 0   ;;  %s2484_s12 = smov 0  }
  0x11   :  { %s2486_s13 = smov 0   ;;  %s2488_s14 = smov 0  }
  0x12   :  { %s2490_s15 = smov 0   ;;  %s2492_s16 = smov 0  }
  0x13   :  { %s2494_s17 = smov 0   ;;  %s2496_s18 = smov 0  }
  0x14   :  { %s2498_s19 = smov 0   ;;  %s2500_s20 = smov 0  }
  0x15   :  { %s2502_s21 = smov 0   ;;  %s2504_s22 = smov 0  }
  0x16 LB: > { %3155 = sst [smem:[#allocation17_spill]] %s2361_s30  ;;  %s2547_s23 = sadd.s32 4294967295, %s2413_s22   ;;  %s2413_s22 = sphi %s2504_s22, %s29_s22   ;;  %s2409_s21 = sphi %s2502_s21, %s3234_s21   ;;  %s2405_s20 = sphi %s2500_s20, %s3221_s20   ;;  %s2401_s19 = sphi %s2498_s19, %s3233_s19   ;;  %s2397_s18 = sphi %s2496_s18, %s3220_s18   ;;  %s2393_s17 = sphi %s2494_s17, %s3232_s17   ;;  %s2389_s16 = sphi %s2492_s16, %s3231_s16   ;;  %s2385_s15 = sphi %s2490_s15, %s3230_s15   ;;  %s2381_s14 = sphi %s2488_s14, %s3229_s14   ;;  %s2377_s13 = sphi %s2486_s13, %s3228_s13   ;;  %s2373_s12 = sphi %s2484_s12, %s3227_s12   ;;  %s2369_s11 = sphi %s2482_s11, %s3226_s11   ;;  %s2365_s10 = sphi %s2480_s10, %s3225_s10   ;;  %s2361_s30 = sphi %s2478_s30, %s3224_s30  }
  0x17   : > { %3156 = sst [smem:[#allocation18_spill]] %s2365_s10  ;;  %s1736_s24 = sadd.s32 4294967294, %s2413_s22  }
  0x18   : > { %3157 = sst [smem:[#allocation19_spill]] %s2397_s18  ;;  %p3130_p0 = scmp.eq.s32.totalorder %s2547_s23, 0 }
  0x19   : > { %3158 = sst [smem:[#allocation20_spill]] %s2401_s19  ;;  %p135_p1 = scmp.ne.s32.totalorder %s2377_s13, %s2373_s12 }
  0x1a   : > { %3159 = sst [smem:[#allocation21_spill]] %s2405_s20  ;;  %p286_p2 = scmp.ne.s32.totalorder %s2369_s11, %s2365_s10 }
  0x1b   : > { %p287_p3 = scmp.eq.s32.totalorder %s2547_s23, 3  ;;  %p2557_p4 = por %p135_p1, %p3130_p0 }
  0x1c   : > { %p292_p5 = scmp.ne.s32.totalorder %s2365_s10, %s2361_s30  ;;  %p293_p7 = scmp.eq.s32.totalorder %s1736_s24, 3 }
  0x1d   : > { %s3160_s25 = scalar_select %p2557_p4, 1, 0 }
  0x1e   : > { %p2563_p6 = por %p287_p3, %p286_p2  ;;  %p1743_p8 = scmp.ge.s32.totalorder %s2413_s22, 1 }
  0x1f   : > { %3161 = sst [smem:[#allocation22_spill]] %s3160_s25  ;;  %p300_p9 = scmp.lt.s32.totalorder %s2413_s22, 5 }
  0x20   : > { %s3162_s26 = scalar_select %p2563_p6, 1, 0 }
  0x21   : > { %p2569_p10 = por %p293_p7, %p292_p5  ;;  %p2573_p11 = pnand %p1743_p8, %p300_p9 }
  0x22   : > { %3163 = sst [smem:[#allocation23_spill]] %s3162_s26  ;;  %s2415_s29 = smov [#allocation8]  }
  0x23   : > { %s3164_s27 = scalar_select %p2569_p10, 1, 0 }
  0x24   : > { %s316_s12 = sshll.u32 %s2415_s29, 4  ;;  %p1970_p12 = pneg %p2573_p11  ;;  %s317_s12 = int_to_ptr.vmem [resolvable:$true] %s316_s12 }
  0x25   : > { %3165 = sst [smem:[#allocation24_spill]] %s3164_s27  ;;  %s2416_s24 = smov [#allocation9]  }
  0x26   : > { %p2581_p13 = pnand %p1970_p12, %p3130_p0  ;;  %s330_s9 = sshll.u32 %s2416_s24, 4  ;;  %s331_s9 = int_to_ptr.vmem [resolvable:$true] %s330_s9 }
  0x27   : > { %s2160_s27 = scalar_lea.vmem %s317_s12, 16  ;;  %s2167_s29 = scalar_lea.vmem %s317_s12, 32 }
  0x28   : > { %p2151_p1 = pneg %p2581_p13  ;;  %p2161_p2 = scmp.ne.s32.totalorder %s317_s12, %s2160_s27 }
  0x29   : > { %p2168_p7 = scmp.lt.s32.totalorder %s317_s12, %s317_s12  ;;  %p2169_p8 = scmp.lt.s32.totalorder %s2167_s29, %s2160_s27 }
  0x2a   : > { %p2163_p3 = pnand %p2161_p2, %p2151_p1 }
  0x2b   : > { %p2170_p9 = por %p2169_p8, %p2168_p7 }
  0x2c   : > { %p2164_p5 = pneg %p2163_p3 }
  0x2e   : > { %p2171_p12 = pnand %p2170_p9, %p2164_p5 }
  0x30   : > { %2174 = shalt.err (!%p2171_p12)
}
  0x31   : > { %s3168_s4 = sld [smem:[#allocation30_spill]]  ;;  %s2186_s24 = scalar_lea.vmem %s331_s9, 16 }
  0x32   : > { %p2187_p0 = scmp.ne.s32.totalorder %s331_s9, %s2186_s24  ;;  %s2193_s7 = scalar_lea.vmem %s331_s9, 32 }
  0x33   : > { %p2194_p3 = scmp.lt.s32.totalorder %s331_s9, %s331_s9  ;;  %p2195_p6 = scmp.lt.s32.totalorder %s2193_s7, %s2186_s24 }
  0x34   : > { %p2189_p10 = pnand %p2187_p0, %p2151_p1 }
  0x35   : > { %p2196_p4 = por %p2195_p6, %p2194_p3 }
  0x36   : > { %p2190_p2 = pneg %p2189_p10 }
  0x37   : > { %1973 = dma.hbm_to_vmem [thread:$0]  (!%p2581_p13), %s3168_s4, 16, %s317_s12, [#allocation7]  }
  0x38   : > { %p2197_p7 = pnand %p2196_p4, %p2190_p2 }
  0x3a   : > { %2200 = shalt.err (!%p2197_p7)
}
  0x3b   : > { %s3169_s6 = sld [smem:[#allocation32_spill]]  ;;  %s38_s8 = sadd.s32 1, %s2405_s20 }
  0x3c   : > { %p39_p0 = scmp.ge.s32.totalorder %s38_s8, 2  ;;  %s41_s7 = sadd.s32 1, %s2409_s21 }
  0x3d   : > { %s1737_s26 = sshll.u32 %s2405_s20, 2  ;;  %s86_s30 = sadd.s32 1, %s2393_s17 }
  0x3e   : > { %s3236_s8 = smov (%p39_p0, %s38_s8), 0  ;;  %s3238_s7 = smov (!%p39_p0, %s41_s7), %s2409_s21 }
  0x3f   : > { %3170 = sst [smem:[#allocation25_spill]] %s3236_s8  ;;  %s1738_s12 = sadd.s32 4294967295, %s1737_s26 }
  0x40   : > { %s1739_s24 = sshll.u32 %s3236_s8, 2  ;;  %p43_p4 = scmp.ge.s32.totalorder %s3238_s7, 2 }
  0x41   : > { %1976 = dma.hbm_to_vmem [thread:$0]  (!%p2581_p13), %s3169_s6, 16, %s331_s9, [#allocation10]  }
  0x42   : > { %p75_p6 = scmp.gt.s32.totalorder %s1738_s12, 0  ;;  %s1740_s9 = sadd.s32 4294967295, %s1739_s24 }
  0x43   : > { %p93_p10 = scmp.ne.s32.totalorder %s2393_s17, %s2389_s16  ;;  %s3240_s7 = smov (%p43_p4, %s3238_s7), 0 }
  0x44   : > { %3171 = sst [smem:[#allocation26_spill]] %s3240_s7  ;;  %s3242_s12 = smov (!%p75_p6, %s1738_s12), 0 }
  0x45   : > { %p79_p13 = scmp.gt.s32.totalorder %s1740_s9, 0  ;;  %s81_s27 = ssub.s32 %s2409_s21, %s3240_s7 }
  0x46   : > { %p94_p1 = scmp.eq.s32.totalorder %s2413_s22, 0  ;;  %p99_p5 = scmp.ne.s32.totalorder %s2389_s16, %s2385_s15 }
  0x47   : > { %s3244_s9 = smov (!%p79_p13, %s1740_s9), 0  ;;  %p3173_p9 = scmp.eq.s32.totalorder %s2547_s23, 0 }
  0x48   : > { %p2624_p8 = por %p94_p1, %p93_p10  ;;  %s82_s6 = ssub.s32 %s3242_s12, %s3244_s9 }
  0x49   : > { %p2630_p12 = por %p3173_p9, %p99_p5  ;;  %s1862_s5 = sadd.s32 4, %s1737_s26 }
  0x4a   : > { %s83_s0 = sor.u32 %s82_s6, %s81_s27  ;;  %p111_p2 = scmp.lt.s32.totalorder %s1862_s5, 7 }
  0x4b   : > { %p84_p3 = scmp.eq.s32.totalorder %s83_s0, 0  ;;  %s1864_s15 = sadd.s32 4, %s1739_s24 }
  0x4c   : > { %s3246_s5 = smov (!%p111_p2, %s1862_s5), 7  ;;  %p115_p7 = scmp.lt.s32.totalorder %s1864_s15, 7 }
  0x4d   : > { %s2636_s7 = scalar_select %p84_p3, %s2393_s17, %s86_s30  }
  0x4e   : > { %s272_s3 = ssub.s32 %s2405_s20, %s3236_s8  ;;  %s276_s18 = sadd.s32 1, %s2369_s11 }
  0x4f   : > { %3175 = sst [smem:[#allocation27_spill]] %s2636_s7  ;;  %s273_s19 = sor.u32 %s272_s3, %s81_s27 }
  0x50   : > { %s3248_s15 = smov (!%p115_p7, %s1864_s15), 7  ;;  %p274_p0 = scmp.eq.s32.totalorder %s273_s19, 0 }
  0x51   : > { %p1990_p4 = scmp.lt.s32.totalorder %s2413_s22, 4  ;;  %s118_s26 = ssub.s32 %s3246_s5, %s3248_s15 }
  0x52   : > { %s360_s6 = sand.u32 1, %s2393_s17   ;;  %s2643_s9 = sor.u32 %s118_s26, %s81_s27 }
  0x53   : > { %p120_p6 = scmp.eq.s32.totalorder %s2643_s9, 0  ;;  %s1747_s0 = sshll.u32 %s360_s6, 2 }
  0x54   : > { %s2647_s24 = scalar_select %p274_p0, %s2369_s11, %s276_s18  }
  0x55   : > { %s1750_s30 = sshll.u32 %s2409_s21, 3  ;;  %s364_s10 = scalar_lea.vmem [#allocation3], %s1747_s0 }
  0x56   : > { %s373_s7 = sadd.s32 %s1750_s30, %s3242_s12  ;;  %s377_s8 = sshll.u32 %s364_s10, 4  ;;  %s378_s8 = int_to_ptr.vmem [resolvable:$true] %s377_s8 }
  0x57   : > { %s1751_s3 = sshll.u32 %s373_s7, 6  ;;  %p2658_p10 = pnand %p1990_p4, %p2624_p8 }
  0x58   : > { %s375_s19 = scalar_lea.hbm %s3116_s1, %s1751_s3  ;;  %s397_s15 = sadd.s32 %s1750_s30, %s3246_s5 }
  0x59   : > { %s361_s18 = scalar_lea.sflag [#allocation4], %s360_s6  ;;  %p2203_p13 = pneg %p2658_p10 }
  0x5a   : > { %s2214_s12 = scalar_lea.vmem %s378_s8, 64  ;;  %s2417_s10 = smov [#allocation3]  }
  0x5b   : > { %p2215_p5 = scmp.ne.s32.totalorder %s378_s8, %s2214_s12  ;;  %s2219_s7 = sshll.u32 %s2417_s10, 4  ;;  %s2220_s7 = int_to_ptr.vmem [resolvable:$false] %s2219_s7 }
  0x5c   : > { %s2221_s20 = scalar_lea.vmem %s2220_s7, 128  ;;  %p2222_p3 = scmp.lt.s32.totalorder %s378_s8, %s2220_s7 }
  0x5d   : > { %p2217_p9 = pnand %p2215_p5, %p2203_p13  ;;  %p2223_p7 = scmp.lt.s32.totalorder %s2221_s20, %s2214_s12 }
  0x5f   : > { %p2218_p2 = pneg %p2217_p9  ;;  %p2224_p0 = por %p2223_p7, %p2222_p3 }
  0x61   : > { %p2225_p8 = pnand %p2224_p0, %p2218_p2 }
  0x63   : > { %2228 = shalt.err (!%p2225_p8)
}
  0x64   : > { %1980 = dma.hbm_to_vmem [thread:$0]  (!%p2658_p10), %s375_s19, 64, %s378_s8, %s361_s18  }
  0x65   : > { %s122_s5 = sadd.s32 1, %s2381_s14  ;;  %p129_p13 = scmp.ne.s32.totalorder %s2381_s14, %s2377_s13 }
  0x66   : > { %s2672_s25 = scalar_select %p120_p6, %s2381_s14, %s122_s5  }
  0x67   : > { %p131_p5 = por %p129_p13, %p94_p1  ;;  %s384_s29 = sand.u32 1, %s2413_s22  }
  0x68   : > { %s386_s26 = sand.u32 1, %s2381_s14   ;;  %s1755_s0 = sshll.u32 %s397_s15, 6 }
  0x69   : > { %s1752_s6 = sshll.u32 %s386_s26, 2  ;;  %s399_s27 = scalar_lea.hbm %s3117_s2, %s1755_s0 }
  0x6a   : > { %s388_s12 = scalar_lea.vmem [#allocation6], %s1752_s6  ;;  %p2683_p9 = pnand %p1990_p4, %p131_p5 }
  0x6b   : > { %s401_s10 = sshll.u32 %s388_s12, 4  ;;  %s385_s9 = scalar_lea.sflag [#allocation7], %s384_s29  ;;  %s402_s10 = int_to_ptr.vmem [resolvable:$true] %s401_s10 }
  0x6c   : > { %p2231_p1 = pneg %p2683_p9  ;;  %s2242_s19 = scalar_lea.vmem %s402_s10, 64 }
  0x6d   : > { %p2243_p6 = scmp.ne.s32.totalorder %s402_s10, %s2242_s19  ;;  %s2418_s15 = smov [#allocation6]  }
  0x6e   : > { %s2247_s18 = sshll.u32 %s2418_s15, 4  ;;  %s2248_s18 = int_to_ptr.vmem [resolvable:$false] %s2247_s18 }
  0x6f   : > { %p2245_p10 = pnand %p2243_p6, %p2231_p1  ;;  %s2249_s7 = scalar_lea.vmem %s2248_s18, 128 }
  0x70   : > { %p2250_p3 = scmp.lt.s32.totalorder %s402_s10, %s2248_s18  ;;  %p2251_p7 = scmp.lt.s32.totalorder %s2249_s7, %s2242_s19 }
  0x71   : > { %p2246_p2 = pneg %p2245_p10 }
  0x72   : > { %p2252_p0 = por %p2251_p7, %p2250_p3 }
  0x74   : > { %p2253_p4 = pnand %p2252_p0, %p2246_p2 }
  0x76   : > { %2256 = shalt.err (!%p2253_p4)
}
  0x77   : > { %1983 = dma.hbm_to_vmem [thread:$0]  (!%p2683_p9), %s399_s27, 64, %s402_s10, %s385_s9  }
  0x78   : > { %410 = sbr.rel (%p2573_p11) target bundleno = 1447 (0x5a7), region = 56  ;;  %s412_s20 = sand.u32 (!%p2573_p11), 1, %s2389_s16  }
  0x79   : > { %s2694_s5 = sshll.u32 (!%p2573_p11), %s412_s20, 2  ;;  %s413_s29 = scalar_lea.sflag (!%p2573_p11), [#allocation4], %s412_s20 }
  0x7a   : > { %s416_s26 = scalar_lea.vmem (!%p2573_p11), [#allocation3], %s2694_s5 }
  0x7d   : > { %2340 = dma.done.wait (%p2630_p12), %s413_s29, 64  }
  0x7e   : > { %2342 = vsyncadd (%p2630_p12), %s413_s29, 4294967232  ;;  %s3178_s6 = sld [smem:[#allocation22_spill]]  ;;  %s421_s0 = sand.u32 1, %s2547_s23  }
  0x7f   : > { %s423_s30 = sand.u32 1, %s2377_s13   ;;  %s422_s3 = scalar_lea.sflag [#allocation7], %s421_s0 }
  0x80   : > { %s2703_s28 = sshll.u32 %s423_s30, 2 }
  0x81   : > { %s425_s27 = scalar_lea.vmem [#allocation6], %s2703_s28 }
  0x84   : > { %p3179_p11 = scmp.ne.s32.totalorder %s3178_s6, 0 }
  0x86   : > { %2344 = dma.done.wait (%p3179_p11), %s422_s3, 64  }
  0x87   : > { %2346 = vsyncadd (%p3179_p11), %s422_s3, 4294967232  ;;  %p3180_p8 = scmp.eq.s32.totalorder %s2547_s23, 0 }
  0x89   : > { %2348 = dma.done.wait (%p3180_p8), [#allocation7], 16   ;;  %p3181_p12 = pmov %p3180_p8 }
  0x8a   : > { %p3182_p13 = pmov %p3180_p8 }
  0x8b   : > { %2350 = vsyncadd (%p3181_p12), [#allocation7], 4294967280 }
  0x8c   : > { %2352 = dma.done.wait (%p3182_p13), [#allocation10], 16   ;;  %p3183_p5 = pmov %p3180_p8 }
  0x8d   : > { %s3184_s4 = sld [smem:[#allocation18_spill]]  ;;  %vm506_vm0 = vcmask 57344   ;;  %vm507_vm1 = vsmask.f32 256  ;;  %vm527_vm3 = vsmask.f32 7938 }
  0x8e   : > { %2354 = vsyncadd (%p3183_p5), [#allocation10], 4294967280  ;;  %s3185_s12 = sld [smem:[#allocation19_spill]]  ;;  %vm580_vm4 = vcmask 261120   ;;  %v509_v4 = vld [vmem:[#allocation2] sm:$0x1] }
  0x8f   : > { %s3186_s10 = sld [smem:[#allocation20_spill]]  ;;  %vm2731_vm2 = vmand %vm506_vm0, %vm507_vm1  ;;  %v518_v8 = vld [vmem:[#allocation2 + $0x18] sm:$0x1]  ;;  %v524_v9 = vld [vmem:[#allocation2 + $0x28] sm:$0x1]  ;;  %vm693_vm6 = vcmask 60416  }
  0x90   : > { %s3189_s29 = sld [smem:[#allocation29_spill]]  ;;  %vm2748_vm5 = vmand %vm506_vm0, %vm527_vm3  ;;  %v510_v7 = vsel %vm2731_vm2, 0, %v509_v4  ;;  %v519_v10 = vsel %vm2731_vm2, 0, %v518_v8  ;;  %v525_v11 = vsel %vm2731_vm2, 0, %v524_v9  ;;  %v529_v12 = vld [vmem:[#allocation2 + $0x4] sm:$0x1] }
  0x91   : > { %511 = vst [vmem:[#allocation2] sm:$0x1] %v510_v7  ;;  %v538_v13 = vld [vmem:[#allocation2 + $0x1c] sm:$0x1]  ;;  %520 = vst [vmem:[#allocation2 + $0x18] sm:$0x1] %v519_v10 }
  0x92   : > { %526 = vst [vmem:[#allocation2 + $0x28] sm:$0x1] %v525_v11  ;;  %v530_v14 = vsel %vm2748_vm5, 0, %v529_v12  ;;  %v539_v15 = vsel %vm2748_vm5, 0, %v538_v13  ;;  %v544_v16 = vld [vmem:[#allocation2 + $0x2c] sm:$0x1]  ;;  %vm2783_vm7 = vmand %vm693_vm6, %vm527_vm3 }
  0x93   : > { %s3146_s8 = sand.u32 1, %s3184_s4   ;;  %531 = vst [vmem:[#allocation2 + $0x4] sm:$0x1] %v530_v14  ;;  %540 = vst [vmem:[#allocation2 + $0x1c] sm:$0x1] %v539_v15  ;;  %v545_v17 = vsel %vm2748_vm5, 0, %v544_v16 }
  0x94   : > { %s2720_s9 = sshll.u32 %s3185_s12, 2  ;;  %s2724_s19 = sshll.u32 %s3146_s8, 4  ;;  %546 = vst [vmem:[#allocation2 + $0x2c] sm:$0x1] %v545_v17  ;;  %v512_v18 = vld [vmem:[#allocation2 + $0x8] sm:$0x1] }
  0x95   : > { %p483_p9 = scmp.lt.s32.totalorder %s3186_s10, 1  ;;  %p485_p1 = scmp.lt.s32.totalorder %s2720_s9, 7  ;;  %v532_v19 = vld [vmem:[#allocation2 + $0xc] sm:$0x1]  ;;  %v513_v20 = vsel %vm2731_vm2, 0, %v512_v18 }
  0x96   : > { %v2116_v1 = vld [vmem:[%s3189_s29 + $0x8] sm:$0xff]   ;;  %v2117_v2 = vld [vmem:[%s3189_s29] sm:$0xff]   ;;  %s3190_s8 = sld [smem:[#allocation28_spill]]  ;;  %v533_v21 = vsel %vm2748_vm5, 0, %v532_v19  ;;  %514 = vst [vmem:[#allocation2 + $0x8] sm:$0x1] %v513_v20 }
  0x97   : > { %s3250_s10 = smov (!%p483_p9, %s3186_s10), 1  ;;  %1898 = vmatprep.subr.bf16.mxu0 %v2116_v1  ;;  %534 = vst [vmem:[#allocation2 + $0xc] sm:$0x1] %v533_v21  ;;  %v521_v22 = vld [vmem:[#allocation2 + $0x20] sm:$0x1]  ;;  %p1776_p6 = scmp.le.s32.totalorder %s3185_s12, 0 }
  0x98   : > { %s486_s23 = scalar_select %p485_p1, %s2720_s9, 7  ;;  %1899 = vmatpush3.bf16.msra.mxu0 %v2116_v1  ;;  %v541_v23 = vld [vmem:[#allocation2 + $0x24] sm:$0x1]  ;;  %v522_v24 = vsel %vm2731_vm2, 0, %v521_v22  ;;  %v515_v26 = vld [vmem:[#allocation2 + $0x10] sm:$0x1] }
  0x99   : > { %s1763_s15 = sshll.u32 %s3250_s10, 3  ;;  %1900 = vmatprep.subr.bf16.mxu0 %v2117_v2  ;;  %v542_v25 = vsel %vm2748_vm5, 0, %v541_v23  ;;  %523 = vst [vmem:[#allocation2 + $0x20] sm:$0x1] %v522_v24  ;;  %v535_v27 = vld [vmem:[#allocation2 + $0x14] sm:$0x1] }
  0x9a   : > { %s488_s18 = sadd.s32 %s1763_s15, %s486_s23  ;;  %543 = vst [vmem:[#allocation2 + $0x24] sm:$0x1] %v542_v25  ;;  %v516_v28 = vsel %vm2731_vm2, 0, %v515_v26  ;;  %v536_v29 = vsel %vm2748_vm5, 0, %v535_v27  ;;  %v1765_v30 = vld [vmem:[#allocation8] ss:$0 sm:$0xff] }
  0x9b   : > { %s1764_s6 = sshll.u32 %s488_s18, 2  ;;  %517 = vst [vmem:[#allocation2 + $0x10] sm:$0x1] %v516_v28  ;;  %537 = vst [vmem:[#allocation2 + $0x14] sm:$0x1] %v536_v29  ;;  %s3195_s18 = sld [smem:[#allocation29_spill]] (!%p1776_p6) }
  0x9c   : > { %s490_s10 = scalar_lea.vmem %s3190_s8, %s1764_s6  ;;  %1901 = vmatpush3.bf16.msra.mxu0 %v2117_v2  ;;  %v707_v50 = vld [vmem:[#allocation2 + $0x18] sm:$0xf]  ;;  %v710_v51 = vld [vmem:[#allocation2 + $0x1c] sm:$0x1]  ;;  %s2804_s8 = scalar_lea.vmem [#allocation11], %s2724_s19 }
  0x9d   : > { %v2744_v3 = vld [vmem:[%s490_s10] sm:$0xff]   ;;  %v2752_v6 = vld [vmem:[%s490_s10 + $0x8] sm:$0xff]  }
  0x9e   : > { %1902 = vmatprep.mubr.msk.bf16.mxu0 %vm580_vm4, %v2744_v3  ;;  %v695_v58 = vld [vmem:[#allocation2 + $0x8] sm:$0xf]  ;;  %v698_v59 = vld [vmem:[#allocation2 + $0xc] sm:$0x1] }
  0x9f   : > { %1903 = vmatmul.mubr.msk.bf16.vlgmr.msra.gmra.mxu0 %vm580_vm4, %v2752_v6 }
  0xa0   : > { %v713_v9 = vld [vmem:[#allocation2 + $0x20] sm:$0xf] }
  0xa1   : > { %v716_v10 = vld [vmem:[#allocation2 + $0x24] sm:$0x1] }
  0xa2   : > { %v701_v15 = vld [vmem:[#allocation2 + $0x10] sm:$0xf]  ;;  %v704_v16 = vld [vmem:[#allocation2 + $0x14] sm:$0x1] }
 0x15f   : > { %v1904_v31 = vpop.f32.mrf.mxu0 }
 0x160   : > { %v630_v32 = vadd.f32 %v1904_v31, %v1765_v30 }
 0x161   : > { %v621_v33 = vpop.f32.mrf.mxu0 }
 0x162   : > { %v638_v34 = vmax.f32 %v630_v32, 0.0  ;;  %v622_v35 = vadd.f32 %v1765_v30, %v621_v33 }
 0x163   : > { %v1905_v36 = vpop.f32.mrf.mxu0 }
 0x164   : > { %v1869_v37 = vpack.c.bf16 %v638_v34, %v638_v34  ;;  %v636_v38 = vmax.f32 %v622_v35, 0.0  ;;  %v633_v39 = vadd.f32 %v1905_v36, %v1765_v30 }
 0x165   : > { %v624_v40 = vpop.f32.mrf.mxu0 }
 0x166   : > { %v669_v41 = vshrl.u32 %v1869_v37, 16  ;;  %v1867_v42 = vpack.c.bf16 %v636_v38, %v636_v38  ;;  %v639_v43 = vmax.f32 %v633_v39, 0.0  ;;  %v625_v44 = vadd.f32 %v1765_v30, %v624_v40 }
 0x167   : > { %v672_v46 = vshll.u32 %v1869_v37, 16 }
 0x168   : > { %v671_v45 = vrot.slane %v669_v41, 7  ;;  %v653_v47 = vshrl.u32 %v1867_v42, 16  ;;  %v1870_v48 = vpack.c.bf16 %v639_v43, %v639_v43  ;;  %v656_v52 = vshll.u32 %v1867_v42, 16 }
 0x169   : > { %v637_v53 = vmax.f32 %v625_v44, 0.0 }
 0x16a   : > { %v674_v54 = vor.u32 %v672_v46, %v671_v45  ;;  %v675_v55 = vrot.slane %v671_v45, 4  ;;  %v655_v56 = vrot.slane %v653_v47, 7  ;;  %v677_v57 = vshrl.u32 %v1870_v48, 16 }
 0x16b   : > { %v1868_v60 = vpack.c.bf16 %v637_v53, %v637_v53  ;;  %v680_v4 = vshll.u32 %v1870_v48, 16 }
 0x16c   : > { %v708_v61 = vsel %vm2783_vm7, %v674_v54, %v707_v50  ;;  %v711_v62 = vsel %vm2731_vm2, %v675_v55, %v710_v51  ;;  %v658_v63 = vor.u32 %v656_v52, %v655_v56  ;;  %v659_v1 = vrot.slane %v655_v56, 4 }
 0x16d   : > { %709 = vst [vmem:[#allocation2 + $0x18] sm:$0xf] %v708_v61  ;;  %712 = vst [vmem:[#allocation2 + $0x1c] sm:$0x1] %v711_v62  ;;  %v679_v2 = vrot.slane %v677_v57, 7  ;;  %v661_v5 = vshrl.u32 %v1868_v60, 16 }
 0x16e   : > { %v696_v7 = vsel %vm2783_vm7, %v658_v63, %v695_v58  ;;  %v699_v8 = vsel %vm2731_vm2, %v659_v1, %v698_v59  ;;  %v664_v14 = vshll.u32 %v1868_v60, 16 }
 0x16f   : > { %697 = vst [vmem:[#allocation2 + $0x8] sm:$0xf] %v696_v7  ;;  %700 = vst [vmem:[#allocation2 + $0xc] sm:$0x1] %v699_v8  ;;  %v682_v11 = vor.u32 %v680_v4, %v679_v2  ;;  %v683_v12 = vrot.slane %v679_v2, 4  ;;  %v663_v13 = vrot.slane %v661_v5, 7 }
 0x170   : > { %722 = sbr.rel (%p1776_p6) target bundleno = 589 (0x24d), region = 76 }
 0x171   : > { %v714_v17 = vsel %vm2783_vm7, %v682_v11, %v713_v9  ;;  %v717_v18 = vsel %vm2731_vm2, %v683_v12, %v716_v10  ;;  %v666_v19 = vor.u32 %v664_v14, %v663_v13  ;;  %v667_v20 = vrot.slane %v663_v13, 4 }
 0x172   : > { %715 = vst [vmem:[#allocation2 + $0x20] sm:$0xf] %v714_v17  ;;  %718 = vst [vmem:[#allocation2 + $0x24] sm:$0x1] %v717_v18 }
 0x173   : > { %v702_v21 = vsel %vm2783_vm7, %v666_v19, %v701_v15  ;;  %v705_v22 = vsel %vm2731_vm2, %v667_v20, %v704_v16 }
 0x174   : > { %703 = vst [vmem:[#allocation2 + $0x10] sm:$0xf] %v702_v21  ;;  %706 = vst [vmem:[#allocation2 + $0x14] sm:$0x1] %v705_v22 }
 0x175   : > { %v2122_v23 = vld [vmem:[%s3195_s18 + $0x8] sm:$0xff]   ;;  %v2419_v24 = vmov 0.0   ;;  %v2123_v25 = vld [vmem:[%s3195_s18] sm:$0xff]   ;;  %vm2420_vm8 = vmmov 0   ;;  %v723_v26 = vld [vmem:[%s416_s26] sm:$0xf] }
 0x176   : > { %1906 = vmatprep.subr.bf16.mxu0 %v2419_v24  ;;  %1910 = vmatprep.mubr.msk.bf16.mxu0 %vm2420_vm8, %v2419_v24  ;;  %v1777_v27 = vld [vmem:[#allocation8] ss:$0 sm:$0xff]  ;;  %v808_v39 = vld [vmem:[#allocation2 + $0x4] sm:$0x1] }
 0x177   : > { %1907 = vmatpush3.bf16.msra.mxu0 %v2122_v23  ;;  %v805_v38 = vld [vmem:[#allocation2] sm:$0xf] }
 0x178   : > { %1908 = vmatprep.subr.bf16.mxu0 %v2419_v24 }
 0x17b   : > { %1909 = vmatpush3.bf16.msra.mxu0 %v2123_v25 }
 0x17e   : > { %1911 = vmatmul.mubr.msk.bf16.vlgmr.msra.gmra.mxu0 %vm580_vm4, %v723_v26 }
 0x23e   : > { %v784_v28 = vpop.f32.mrf.mxu0 }
 0x23f   : > { %v785_v29 = vadd.f32 %v1777_v27, %v784_v28 }
 0x240   : > { %v1912_v30 = vpop.f32.mrf.mxu0 }
 0x241   : > { %v790_v31 = vmax.f32 %v785_v29, 0.0 }
 0x242   : > { %v787_v32 = vpop.f32.mrf.mxu0 }
 0x243   : > { %v1871_v33 = vpack.c.bf16 %v790_v31, %v790_v31 }
 0x244   : > { %v1913_v34 = vpop.f32.mrf.mxu0 }
 0x245   : > { %v796_v35 = vshrl.u32 %v1871_v33, 16  ;;  %v799_v37 = vshll.u32 %v1871_v33, 16 }
 0x247   : > { %v798_v36 = vrot.slane %v796_v35, 7 }
 0x249   : > { %v801_v40 = vor.u32 %v799_v37, %v798_v36  ;;  %v802_v41 = vrot.slane %v798_v36, 4 }
 0x24b   : > { %v806_v42 = vsel %vm2783_vm7, %v801_v40, %v805_v38  ;;  %v809_v43 = vsel %vm2731_vm2, %v802_v41, %v808_v39 }
 0x24c   : > { %807 = vst [vmem:[#allocation2] sm:$0xf] %v806_v42  ;;  %810 = vst [vmem:[#allocation2 + $0x4] sm:$0x1] %v809_v43 }
 0x24d PF: > { %s3196_s5 = sld [smem:[#allocation19_spill]] }
 0x253   : > { %p1782_p10 = scmp.ne.s32.totalorder %s3196_s5, 0 }
 0x255   : > { %814 = sbr.rel (%p1782_p10) target bundleno = 605 (0x25d), region = 80 }
 0x25a   : > { %v815_v44 = vld [vmem:[#allocation2] sm:$0xf]  ;;  %v818_v45 = vld [vmem:[#allocation2 + $0x4] sm:$0x1] }
 0x25b   : > { %v816_v46 = vsel %vm2783_vm7, 0, %v815_v44  ;;  %v819_v47 = vsel %vm2731_vm2, 0, %v818_v45 }
 0x25c   : > { %817 = vst [vmem:[#allocation2] sm:$0xf] %v816_v46  ;;  %820 = vst [vmem:[#allocation2 + $0x4] sm:$0x1] %v819_v47 }
 0x25d PF: > { %s3197_s26 = sld [smem:[#allocation19_spill]] }
 0x263   : > { %p1783_p2 = scmp.ge.s32.totalorder %s3197_s26, 1 }
 0x264   : > { %s3198_s29 = sld [smem:[#allocation29_spill]] (!%p1783_p2) }
 0x265   : > { %824 = sbr.rel (%p1783_p2) target bundleno = 834 (0x342), region = 84 }
 0x26a   : > { %v2124_v48 = vld [vmem:[%s3198_s29 + $0x8] sm:$0xff]   ;;  %v2421_v50 = vmov 0.0   ;;  %v2125_v51 = vld [vmem:[%s3198_s29] sm:$0xff]   ;;  %vm2422_vm9 = vmmov 0   ;;  %v825_v52 = vld [vmem:[%s425_s27] sm:$0xf] }
 0x26b   : > { %1914 = vmatprep.subr.bf16.mxu0 %v2421_v50  ;;  %1918 = vmatprep.mubr.msk.bf16.mxu0 %vm2422_vm9, %v2421_v50  ;;  %v1784_v53 = vld [vmem:[#allocation8] ss:$0 sm:$0xff]  ;;  %v908_v1 = vld [vmem:[#allocation2 + $0x28] sm:$0xf]  ;;  %v911_v2 = vld [vmem:[#allocation2 + $0x2c] sm:$0x1] }
 0x26c   : > { %1915 = vmatpush3.bf16.msra.mxu0 %v2124_v48 }
 0x26d   : > { %1916 = vmatprep.subr.bf16.mxu0 %v2421_v50 }
 0x270   : > { %1917 = vmatpush3.bf16.msra.mxu0 %v2125_v51 }
 0x273   : > { %1919 = vmatmul.mubr.msk.bf16.vlgmr.msra.gmra.mxu0 %vm580_vm4, %v825_v52 }
 0x333   : > { %v886_v54 = vpop.f32.mrf.mxu0 }
 0x334   : > { %v887_v55 = vadd.f32 %v1784_v53, %v886_v54 }
 0x335   : > { %v1920_v56 = vpop.f32.mrf.mxu0 }
 0x336   : > { %v892_v57 = vmax.f32 %v887_v55, 0.0 }
 0x337   : > { %v889_v58 = vpop.f32.mrf.mxu0 }
 0x338   : > { %v1872_v59 = vpack.c.bf16 %v892_v57, %v892_v57 }
 0x339   : > { %v1921_v60 = vpop.f32.mrf.mxu0 }
 0x33a   : > { %v898_v61 = vshrl.u32 %v1872_v59, 16  ;;  %v901_v63 = vshll.u32 %v1872_v59, 16 }
 0x33c   : > { %v900_v62 = vrot.slane %v898_v61, 7 }
 0x33e   : > { %v903_v4 = vor.u32 %v901_v63, %v900_v62  ;;  %v904_v5 = vrot.slane %v900_v62, 4 }
 0x340   : > { %v909_v7 = vsel %vm2783_vm7, %v903_v4, %v908_v1  ;;  %v912_v8 = vsel %vm2731_vm2, %v904_v5, %v911_v2 }
 0x341   : > { %910 = vst [vmem:[#allocation2 + $0x28] sm:$0xf] %v909_v7  ;;  %913 = vst [vmem:[#allocation2 + $0x2c] sm:$0x1] %v912_v8 }
 0x342 PF: > { %s3199_s28 = sld [smem:[#allocation19_spill]] }
 0x348   : > { %p1789_p3 = scmp.ne.s32.totalorder %s3199_s28, 1 }
 0x34a   : > { %917 = sbr.rel (%p1789_p3) target bundleno = 850 (0x352), region = 88 }
 0x34f   : > { %v919_v9 = vld [vmem:[#allocation2 + $0x28] sm:$0xf]  ;;  %v922_v10 = vld [vmem:[#allocation2 + $0x2c] sm:$0x1] }
 0x350   : > { %v920_v11 = vsel %vm2783_vm7, 0, %v919_v9  ;;  %v923_v12 = vsel %vm2731_vm2, 0, %v922_v10 }
 0x351   : > { %921 = vst [vmem:[#allocation2 + $0x28] sm:$0xf] %v920_v11  ;;  %924 = vst [vmem:[#allocation2 + $0x2c] sm:$0x1] %v923_v12 }
 0x352 PF: > { %v2844_v13 = vld [vmem:[#allocation2 + $0x18] sm:$0xf]  ;;  %v990_v14 = vld [vmem:[#allocation2 + $0x1c] sm:$0x1]  ;;  %v2849_v16 = vld [vmem:[#allocation2 + $0x8] sm:$0xf] }
 0x353   : > { %v2847_v15 = vcombine.low %v2844_v13, %v990_v14  ;;  %v988_v17 = vld [vmem:[#allocation2 + $0xc] sm:$0x1]  ;;  %v929_v49 = vld [vmem:[#allocation2 + $0x20] sm:$0xf]  ;;  %v991_v19 = vld [vmem:[#allocation2 + $0x24] sm:$0x1]  ;;  %v1790_v44 = vcombine.low %v2849_v16, %v2849_v16  ;;  %v1792_v46 = vcombine.low %v2844_v13, %v2844_v13 }
 0x354   : > { %v2852_v18 = vcombine.low %v2849_v16, %v988_v17  ;;  %v2854_v20 = vld [vmem:[#allocation2 + $0x10] sm:$0xf]  ;;  %s2423_s27 = smov 8   ;;  %v1799_v0 = vcombine.low %v929_v49, %v991_v19  ;;  %v989_v21 = vld [vmem:[#allocation2 + $0x14] sm:$0x1]  ;;  %s3200_s4 = sld [smem:[#allocation31_spill]]  ;;  %v1793_v45 = vcombine.low %v929_v49, %v929_v49 }
 0x355   : > { %1014 = vrot.lane.b32.xlu1 %v2847_v15, %s2423_s27  ;;  %v2861_v22 = vcombine.low %v2854_v20, %v989_v21  ;;  %vm1154_vm10 = vcmask 1043456   ;;  %s2424_s10 = smov 16   ;;  %v1286_v28 = vld [vmem:[#allocation2 + $0x10] sm:$0xe]  ;;  %v1285_v29 = vld [vmem:[#allocation2 + $0x8] sm:$0xe]  ;;  %v1791_v41 = vcombine.low %v2854_v20, %v2854_v20 }
 0x356   : > { %1010 = vrot.lane.b32.xlu0 %v2852_v18, %s2423_s27  ;;  %v2879_v31 = vcombine.low %v1286_v28, %v989_v21  ;;  %v2881_v32 = vcombine.low %v1285_v29, %v988_v17  ;;  %v1288_v33 = vld [vmem:[#allocation2 + $0x20] sm:$0xe]  ;;  %v1287_v34 = vld [vmem:[#allocation2 + $0x18] sm:$0xe]  ;;  %v2928_v51 = vld [vmem:[#allocation2 + $0x4] sm:$0x1] }
 0x357   : > { %v1828_v35 = vcombine.low %v1288_v33, %v991_v19  ;;  %v2893_v37 = vcombine.low %v1287_v34, %v990_v14  ;;  %v2930_v52 = vld [vmem:[#allocation2] sm:$0xf]  ;;  %vm962_vm11 = vcmask 64512   ;;  %vm975_vm12 = vcmask 130048   ;;  %s3205_s28 = sld [smem:[#allocation33_spill]]  ;;  %s1584_s5 = sshll.u32 %s2804_s8, 4  ;;  %s3032_s5 = int_to_ptr.vmem [resolvable:$true] %s1584_s5 }
 0x358   : > { %v930_v23 = vld [vmem:[#allocation2 + $0x28] sm:$0xf]  ;;  %v992_v24 = vld [vmem:[#allocation2 + $0x2c] sm:$0x1]  ;;  %v1795_v54 = vcombine.low %v2930_v52, %v2928_v51  ;;  %vm1069_vm13 = vsmask.f32 3328 }
 0x359   : > { %1016 = vrot.lane.b32.xlu1 %v1799_v0, %s2423_s27  ;;  %v1800_v26 = vcombine.low %v930_v23, %v992_v24  ;;  %v1289_v38 = vld [vmem:[#allocation2 + $0x28] sm:$0xe]  ;;  %v1794_v47 = vcombine.low %v930_v23, %v930_v23  ;;  %vm1070_vm14 = vsmask.f32 7440  ;;  %vm1147_vm0 = vcmask 195584   ;;  %s3208_s18 = sld [smem:[#allocation18_spill]] }
 0x35a   : > { %1012 = vrot.lane.b32.xlu0 %v2861_v22, %s2423_s27  ;;  %v2143_v25 = vld [vmem:[%s3200_s4 + $0x14] ss:$0 sps:$4 sm:$0xff]   ;;  %v2144_v30 = vld [vmem:[%s3200_s4 + $0xc] sm:$0xff]   ;;  %v2889_v36 = vld [vmem:[%s3200_s4 + $0x20] ss:$0 sps:$4 sm:$0xff]   ;;  %v1829_v39 = vcombine.low %v1289_v38, %v992_v24  ;;  %vm1364_vm1 = vcmask 1042432  }
 0x35b   : > { %1952 = vmatprep.subr.msk.bf16.mxu0 %vm1154_vm10, %v2143_v25  ;;  %v1156_v27 = vsel %vm1154_vm10, %v2143_v25, 0  ;;  %v2147_v40 = vld [vmem:[%s3200_s4 + $0x8] ss:$0 sps:$4 sm:$0xff]   ;;  %v2148_v43 = vld [vmem:[%s3200_s4] sm:$0xff]   ;;  %vm2948_vm15 = vmor %vm1069_vm13, %vm1070_vm14  ;;  %vm1365_vm2 = vcmask 1046532   ;;  %vm1563_vm4 = vcmask 257024  }
 0x35c   : > { %1923 = vmatpush3.bf16.msra.mxu0 %v1156_v27  ;;  %1953 = vmatprep.subr.msk.bf16.mxu1 %vm1154_vm10, %v2147_v40  ;;  %v1233_v42 = vsel %vm1154_vm10, %v2147_v40, 0  ;;  %v1284_v24 = vld [vmem:[#allocation2] sm:$0xe]  ;;  %vm2964_vm3 = vmor %vm1364_vm1, %vm1365_vm2  ;;  %s3209_s7 = sld [smem:[#allocation23_spill]] }
 0x35d   : > { %1023 = vrot.lane.b32.xlu1 %v2847_v15, %s2424_s10  ;;  %1924 = vmatprep.subr.bf16.mxu0 %v2144_v30  ;;  %s3210_s12 = sld [smem:[#allocation35_spill]] }
 0x35e   : > { %1021 = vrot.lane.b32.xlu0 %v2861_v22, %s2424_s10  ;;  %1931 = vmatpush3.bf16.msra.mxu1 %v1233_v42 }
 0x35f   : > { %1932 = vmatprep.subr.bf16.mxu1 %v2148_v43  ;;  %s3212_s6 = sand.u32 1, %s3208_s18  }
 0x360   : > { %1925 = vmatpush3.bf16.msra.mxu0 %v2144_v30  ;;  %s3040_s0 = scalar_lea.sflag [#allocation5], %s3212_s6 }
 0x361   : > { %1027 = vrot.lane.b32.xlu1 %v1800_v26, %s2424_s10  ;;  %1954 = vmatprep.subr.msk.bf16.mxu0 %vm1154_vm10, %v2889_v36 }
 0x362   : > { %1025 = vrot.lane.b32.xlu0 %v1799_v0, %s2424_s10  ;;  %1933 = vmatpush3.bf16.msra.mxu1 %v2148_v43  ;;  %p3213_p0 = scmp.ne.s32.totalorder %s3209_s7, 0 }
 0x363   : > { %s3211_s29 = smov %s3210_s12 }
 0x365   : > { %1307 = vrot.lane.b32.xlu1 %v2879_v31, %s2423_s27 }
 0x366   : > { %1305 = vrot.lane.b32.xlu0 %v2881_v32, %s2423_s27 }
 0x369   : > { %1311 = vrot.lane.b32.xlu1 %v1828_v35, %s2423_s27 }
 0x36a   : > { %1309 = vrot.lane.b32.xlu0 %v2893_v37, %s2423_s27 }
 0x36d   : > { %1318 = vrot.lane.b32.xlu1 %v2893_v37, %s2424_s10 }
 0x36e   : > { %1316 = vrot.lane.b32.xlu0 %v2879_v31, %s2424_s10 }
 0x371   : > { %1322 = vrot.lane.b32.xlu1 %v1829_v39, %s2424_s10  ;;  %v1824_v39 = vcombine.low %v1284_v24, %v2928_v51 }
 0x372   : > { %1320 = vrot.lane.b32.xlu0 %v1828_v35, %s2424_s10 }
 0x375   : > { %945 = vrot.lane.b32.xlu1 %v1791_v41, %s2423_s27 }
 0x376   : > { %943 = vrot.lane.b32.xlu0 %v1790_v44, %s2423_s27 }
 0x379   : > { %949 = vrot.lane.b32.xlu1 %v1793_v45, %s2423_s27 }
 0x37a   : > { %947 = vrot.lane.b32.xlu0 %v1792_v46, %s2423_s27  ;;  %s3206_s27 = sld [smem:[#allocation20_spill]] }
 0x37d   : > { %956 = vrot.lane.b32.xlu1 %v1792_v46, %s2424_s10 }
 0x37e   : > { %954 = vrot.lane.b32.xlu0 %v1791_v41, %s2424_s10 }
 0x380   : > { %s1857_s23 = sshll.u32 %s3206_s27, 3  ;;  %s2425_s27 = smov [#allocation11]  }
 0x381   : > { %960 = vrot.lane.b32.xlu1 %v1794_v47, %s2424_s10  ;;  %s1581_s15 = sadd.s32 %s1857_s23, %s2720_s9  ;;  %s2261_s30 = sshll.u32 %s2425_s27, 4  ;;  %s2262_s30 = int_to_ptr.vmem [resolvable:$false] %s2261_s30 }
 0x382   : > { %958 = vrot.lane.b32.xlu0 %v1793_v45, %s2424_s10  ;;  %s3207_s10 = sld [smem:[#allocation34_spill]]  ;;  %s1858_s20 = sshll.u32 %s1581_s15, 6 }
 0x383   : > { %s3030_s19 = scalar_lea.hbm %s3210_s12, %s1858_s20  ;;  %s2263_s3 = scalar_lea.vmem %s2262_s30, 512 }
 0x384   : > { %p2264_p8 = scmp.lt.s32.totalorder %s3032_s5, %s2262_s30 }
 0x3c7   : > { %v1015_v48 = vpop.permute.xlu1 %1014 }
 0x3c8   : > { %v1011_v50 = vpop.permute.xlu0 %1010  ;;  %v1037_v9 = vsel %vm962_vm11, %v2861_v22, %v1015_v48 }
 0x3c9   : > { %v1031_v58 = vsel %vm962_vm11, %v1795_v54, %v1011_v50 }
 0x3cb   : > { %v1017_v53 = vpop.permute.xlu1 %1016 }
 0x3cc   : > { %v1013_v55 = vpop.permute.xlu0 %1012  ;;  %v1040_v4 = vsel %vm962_vm11, %v2847_v15, %v1017_v53 }
 0x3cd   : > { %v1034_v56 = vsel %vm962_vm11, %v2852_v18, %v1013_v55 }
 0x3cf   : > { %v1024_v57 = vpop.permute.xlu1 %1023 }
 0x3d0   : > { %v1044_v59 = vsel %vm975_vm12, %v1034_v56, %v1024_v57  ;;  %v1022_v60 = vpop.permute.xlu0 %1021 }
 0x3d1   : > { %v1803_v61 = vcombine.low %v1044_v59, %v1044_v59  ;;  %v1804_v62 = vcombine.high %v1044_v59, %v1044_v59  ;;  %v1042_v63 = vsel %vm975_vm12, %v1031_v58, %v1022_v60 }
 0x3d2   : > { %v1801_v1 = vcombine.low %v1042_v63, %v1042_v63  ;;  %v1802_v2 = vcombine.high %v1042_v63, %v1042_v63 }
 0x3d3   : > { %v1087_v5 = vshrl.u32 %v1803_v61, 16  ;;  %v1090_v7 = vshll.u32 %v1803_v61, 16  ;;  %v1028_v8 = vpop.permute.xlu1 %1027  ;;  %v1096_v49 = vshll.u32 %v1804_v62, 16 }
 0x3d4   : > { %v1073_v10 = vshrl.u32 %v1801_v1, 16  ;;  %v1076_v11 = vshll.u32 %v1801_v1, 16  ;;  %v1048_v12 = vsel %vm975_vm12, %v1040_v4, %v1028_v8  ;;  %v1026_v14 = vpop.permute.xlu0 %1025  ;;  %v1082_v23 = vshll.u32 %v1802_v2, 16 }
 0x3d5   : > { %v1089_v17 = vrot.slane %v1087_v5, 4  ;;  %v1092_v18 = vrot.slane %v1090_v7, 5  ;;  %v1807_v19 = vcombine.low %v1048_v12, %v1048_v12  ;;  %v1808_v15 = vcombine.high %v1048_v12, %v1048_v12 }
 0x3d6   : > { %v1075_v0 = vrot.slane %v1073_v10, 4  ;;  %v1078_v21 = vrot.slane %v1076_v11, 5  ;;  %v1046_v28 = vsel %vm975_vm12, %v1037_v9, %v1026_v14  ;;  %v1098_v40 = vrot.slane %v1096_v49, 5 }
 0x3d7   : > { %v1093_v25 = vor.u32 %v1092_v18, %v1089_v17  ;;  %v1115_v26 = vshrl.u32 %v1807_v19, 16  ;;  %v1118_v27 = vshll.u32 %v1807_v19, 16  ;;  %v1308_v22 = vpop.permute.xlu1 %1307  ;;  %v1805_v30 = vcombine.low %v1046_v28, %v1046_v28 }
 0x3d8   : > { %v1079_v29 = vor.u32 %v1078_v21, %v1075_v0  ;;  %v1806_v33 = vcombine.high %v1046_v28, %v1046_v28  ;;  %v1306_v34 = vpop.permute.xlu0 %1305  ;;  %v1124_v41 = vshll.u32 %v1808_v15, 16  ;;  %v1084_v45 = vrot.slane %v1082_v23, 5  ;;  %v2146_v15 = vld [vmem:[%s3200_s4 + $0x18] sm:$0xff]  }
 0x3d9   : > { %v1117_v35 = vrot.slane %v1115_v26, 4  ;;  %v1120_v38 = vrot.slane %v1118_v27, 5  ;;  %v1101_v42 = vshrl.u32 %v1805_v30, 16  ;;  %v1104_v43 = vshll.u32 %v1805_v30, 16 }
 0x3da   : > { %v1080_v48 = vrot.slane %v1079_v29, 4  ;;  %v1094_v50 = vrot.slane %v1093_v25, 4  ;;  %v1110_v55 = vshll.u32 %v1806_v33, 16  ;;  %v1126_v59 = vrot.slane %v1124_v41, 5 }
 0x3db   : > { %v1121_v46 = vor.u32 %v1120_v38, %v1117_v35  ;;  %v1312_v47 = vpop.permute.xlu1 %1311  ;;  %v1103_v53 = vrot.slane %v1101_v42, 4  ;;  %v1106_v54 = vrot.slane %v1104_v43, 5  ;;  %v1329_v62 = vsel %vm962_vm11, %v2881_v32, %v1308_v22 }
 0x3dc   : > { %v1310_v56 = vpop.permute.xlu0 %1309  ;;  %v1085_v57 = vsel %vm2948_vm15, %v1080_v48, %v1084_v45  ;;  %v1099_v58 = vsel %vm2948_vm15, %v1094_v50, %v1098_v40  ;;  %v1326_v63 = vsel %vm962_vm11, %v1824_v39, %v1306_v34  ;;  %v1112_v4 = vrot.slane %v1110_v55, 5 }
 0x3dd   : > { %v1122_v51 = vrot.slane %v1121_v46, 4  ;;  %v1107_v60 = vor.u32 %v1106_v54, %v1103_v53  ;;  %v1812_v61 = vcombine.low %v1085_v57, %v1099_v58  ;;  %v1409_v18 = vsel %vm1154_vm10, %v2889_v36, 0 }
 0x3de   : > { %v1335_v49 = vsel %vm962_vm11, %v2893_v37, %v1312_v47  ;;  %v1332_v24 = vsel %vm962_vm11, %v2879_v31, %v1310_v56 }
 0x3df   : > { %v1319_v1 = vpop.permute.xlu1 %1318  ;;  %v1108_v2 = vrot.slane %v1107_v60, 4  ;;  %1926 = vmatprep.mubr.msk.bf16.mxu0 %vm1147_vm0, %v1812_v61  ;;  %v1127_v8 = vsel %vm2948_vm15, %v1122_v51, %v1126_v59 }
 0x3e0   : > { %v1339_v5 = vsel %vm975_vm12, %v1329_v62, %v1319_v1  ;;  %v1317_v7 = vpop.permute.xlu0 %1316  ;;  %v1481_v62 = vld [vmem:[%s3205_s28] sm:$0xf]  ;;  %s2257_s28 = scalar_lea.vmem %s3032_s5, 256 }
 0x3e1   : > { %v1832_v9 = vcombine.low %v1339_v5, %v1339_v5  ;;  %v1833_v10 = vcombine.high %v1339_v5, %v1339_v5  ;;  %v1337_v11 = vsel %vm975_vm12, %v1326_v63, %v1317_v7  ;;  %v1113_v17 = vsel %vm2948_vm15, %v1108_v2, %v1112_v4  ;;  %1955 = vmatprep.subr.msk.bf16.mxu1 %vm1154_vm10, %v1481_v62  ;;  %p2258_p7 = scmp.ne.s32.totalorder %s3032_s5, %s2257_s28  ;;  %p2265_p12 = scmp.lt.s32.totalorder %s2263_s3, %s2257_s28 }
 0x3e2   : > { %v1830_v12 = vcombine.low %v1337_v11, %v1337_v11  ;;  %v1831_v14 = vcombine.high %v1337_v11, %v1337_v11  ;;  %v1813_v21 = vcombine.low %v1113_v17, %v1127_v8 }
 0x3e3   : > { %v1839_v19 = vrot.slane %v1832_v9, 9  ;;  %v1373_v0 = vrot.slane %v1833_v10, 5  ;;  %v1323_v23 = vpop.permute.xlu1 %1322  ;;  %p2259_p4 = pnand %p2258_p7, %p3213_p0  ;;  %p2266_p13 = por %p2265_p12, %p2264_p8 }
 0x3e4   : > { %v1838_v25 = vrot.slane %v1830_v12, 9  ;;  %v1369_v26 = vrot.slane %v1831_v14, 5  ;;  %v1343_v27 = vsel %vm975_vm12, %v1335_v49, %v1323_v23  ;;  %v1321_v28 = vpop.permute.xlu0 %1320  ;;  %1927 = vmatmul.mubr.msk.bf16.vlgmr.msra.gmra.mxu0 %vm1147_vm0, %v1813_v21  ;;  %v1851_v49 = vld [vmem:[#allocation9] ss:$0 sm:$0xff] }
 0x3e5   : > { %v1374_v36 = vsel %vm2964_vm3, %v1839_v19, %v1373_v0  ;;  %v1836_v37 = vcombine.low %v1343_v27, %v1343_v27  ;;  %v1837_v22 = vcombine.high %v1343_v27, %v1343_v27  ;;  %v1341_v29 = vsel %vm975_vm12, %v1332_v24, %v1321_v28  ;;  %1939 = vmatpush3.bf16.msra.mxu0 %v1409_v18  ;;  %p2260_p11 = pneg %p2259_p4 }
 0x3e6   : > { %v1370_v30 = vsel %vm2964_vm3, %v1838_v25, %v1369_v26  ;;  %v1834_v33 = vcombine.low %v1341_v29, %v1341_v29  ;;  %v1835_v34 = vcombine.high %v1341_v29, %v1341_v29  ;;  %1940 = vmatprep.subr.bf16.mxu0 %v2146_v15 }
 0x3e7   : > { %v1841_v31 = vrot.slane %v1836_v37, 9  ;;  %v1381_v35 = vrot.slane %v1837_v22, 5  ;;  %v946_v38 = vpop.permute.xlu1 %945  ;;  %v1845_v39 = vcombine.low %v1370_v30, %v1374_v36  ;;  %v1852_v30 = vld [vmem:[%s3207_s10] ss:$0 sm:$0xff]  ;;  %p2267_p5 = pnand %p2266_p13, %p2260_p11 }
 0x3e8   : > { %v1840_v40 = vrot.slane %v1834_v33, 9  ;;  %v1377_v41 = vrot.slane %v1835_v34, 5  ;;  %v944_v42 = vpop.permute.xlu0 %943  ;;  %v968_v48 = vsel %vm962_vm11, %v2849_v16, %v946_v38  ;;  %v1549_v33 = vunpack.c.l.bf16 %v2752_v6 }
 0x3e9   : > { %v1382_v43 = vsel %vm2964_vm3, %v1841_v31, %v1381_v35  ;;  %1942 = vmatprep.mubr.msk.bf16.mxu0 %vm1147_vm0, %v1845_v39  ;;  %1941 = vmatpush3.bf16.msra.mxu0 %v2146_v15  ;;  %v965_v53 = vsel %vm962_vm11, %v2930_v52, %v944_v42  ;;  %v1547_v35 = vunpack.c.l.bf16 %v2744_v3 }
 0x3ea   : > { %v1378_v44 = vsel %vm2964_vm3, %v1840_v40, %v1377_v41  ;;  %v1550_v41 = vunpack.c.h.bf16 %v2752_v6 }
 0x3eb   : > { %v1846_v45 = vcombine.low %v1378_v44, %v1382_v43  ;;  %v950_v46 = vpop.permute.xlu1 %949 }
 0x3ec   : > { %v948_v47 = vpop.permute.xlu0 %947  ;;  %v974_v57 = vsel %vm962_vm11, %v2844_v13, %v950_v46  ;;  %v1496_v13 = vsel %vm1154_vm10, %v1481_v62, 0  ;;  %v1548_v46 = vunpack.c.h.bf16 %v2744_v3 }
 0x3ed   : > { %1943 = vmatmul.mubr.msk.bf16.vlgmr.msra.gmra.mxu0 %vm1147_vm0, %v1846_v45  ;;  %v971_v59 = vsel %vm962_vm11, %v2854_v20, %v948_v47 }
 0x3ef   : > { %v957_v50 = vpop.permute.xlu1 %956 }
 0x3f0   : > { %v979_v54 = vsel %vm975_vm12, %v968_v48, %v957_v50  ;;  %v955_v55 = vpop.permute.xlu0 %954 }
 0x3f1   : > { %v977_v56 = vsel %vm975_vm12, %v965_v53, %v955_v55 }
 0x3f2   : > { %v1818_v51 = vcombine.low %v977_v56, %v979_v54 }
 0x3f3   : > { %v961_v58 = vpop.permute.xlu1 %960 }
 0x3f4   : > { %v983_v60 = vsel %vm975_vm12, %v974_v57, %v961_v58  ;;  %v959_v16 = vpop.permute.xlu0 %958  ;;  %1934 = vmatprep.mubr.msk.bf16.mxu1 %vm1147_vm0, %v1818_v51 }
 0x3f5   : > { %v981_v52 = vsel %vm975_vm12, %v971_v59, %v959_v16 }
 0x3f6   : > { %v1819_v61 = vcombine.low %v981_v52, %v983_v60 }
 0x3f8   : > { %1935 = vmatmul.mubr.msk.bf16.vlgmr.msra.gmra.mxu1 %vm1147_vm0, %v1819_v61 }
 0x3f9   : > { %1947 = vmatpush3.bf16.msra.mxu1 %v1496_v13 }
 0x4a4   : > { %v1928_v20 = vpop.f32.mrf.mxu0 }
 0x4a6   : > { %v1192_v63 = vpop.f32.mrf.mxu0 }
 0x4a8   : > { %v1929_v1 = vpop.f32.mrf.mxu0 }
 0x4aa   : > { %v1195_v2 = vpop.f32.mrf.mxu0 }
 0x4ad   : > { %v1944_v4 = vpop.f32.mrf.mxu0 }
 0x4af   : > { %v1445_v5 = vpop.f32.mrf.mxu0 }
 0x4b1   : > { %v1945_v11 = vpop.f32.mrf.mxu0 }
 0x4b3   : > { %v1448_v21 = vpop.f32.mrf.mxu0 }
 0x4b8   : > { %v1936_v7 = vpop.f32.mrf.mxu1 }
 0x4b9   : > { %v1278_v8 = vadd.f32 %v1936_v7, %v1928_v20 }
 0x4ba   : > { %v1269_v9 = vpop.f32.mrf.mxu1 }
 0x4bb   : > { %v1270_v10 = vadd.f32 %v1269_v9, %v1192_v63  ;;  %v1462_v17 = vadd.f32 %v1944_v4, %v1278_v8 }
 0x4bc   : > { %v1937_v32 = vpop.f32.mrf.mxu1 }
 0x4bd   : > { %v1460_v12 = vadd.f32 %v1445_v5, %v1270_v10  ;;  %v1281_v14 = vadd.f32 %v1937_v32, %v1929_v1  ;;  %v1473_v25 = vadd.f32 %v1851_v49, %v1462_v17 }
 0x4be   : > { %v1272_v18 = vpop.f32.mrf.mxu1 }
 0x4bf   : > { %v1463_v19 = vadd.f32 %v1945_v11, %v1281_v14  ;;  %v1273_v0 = vadd.f32 %v1272_v18, %v1195_v2  ;;  %v1471_v23 = vadd.f32 %v1851_v49, %v1460_v12  ;;  %v1477_v37 = vmax.f32 %v1473_v25, 0.0 }
 0x4c1   : > { %v1474_v15 = vadd.f32 %v1851_v49, %v1463_v19  ;;  %v1461_v24 = vadd.f32 %v1448_v21, %v1273_v0  ;;  %v1475_v28 = vmax.f32 %v1471_v23, 0.0 }
 0x4c3   : > { %v1472_v26 = vadd.f32 %v1851_v49, %v1461_v24  ;;  %v1478_v27 = vmax.f32 %v1474_v15, 0.0 }
 0x4c5   : > { %v1476_v36 = vmax.f32 %v1472_v26, 0.0  ;;  %v1480_v29 = vpack.c.bf16 %v1478_v27, %v1477_v37 }
 0x4c7   : > { %v1479_v22 = vpack.c.bf16 %v1476_v36, %v1475_v28 }
 0x4c9   : > { %1948 = vmatprep.mubr.msk.bf16.mxu1 %vm962_vm11, %v1479_v22 }
 0x4ca   : > { %1949 = vmatmul.mubr.msk.bf16.vlgmr.msra.gmra.mxu1 %vm962_vm11, %v1480_v29 }
 0x58a   : > { %v1950_v34 = vpop.f32.mrf.mxu1 }
 0x58b   : > { %v1541_v31 = vadd.f32 %v1950_v34, %v1852_v30 }
 0x58c   : > { %v1532_v38 = vpop.f32.mrf.mxu1 }
 0x58d   : > { %v1553_v39 = vadd.f32 %v1549_v33, %v1541_v31  ;;  %v1533_v40 = vadd.f32 %v1852_v30, %v1532_v38 }
 0x58e   : > { %v1951_v42 = vpop.f32.mrf.mxu1 }
 0x58f   : > { %v1557_v43 = vmax.f32 %v1553_v39, 0.0  ;;  %v1551_v44 = vadd.f32 %v1547_v35, %v1533_v40  ;;  %v1544_v45 = vadd.f32 %v1951_v42, %v1852_v30 }
 0x590   : > { %v1535_v47 = vpop.f32.mrf.mxu1 }
 0x591   : > { %v1561_v48 = vpack.c.bf16 %v1557_v43, %v1557_v43  ;;  %v1555_v50 = vmax.f32 %v1551_v44, 0.0  ;;  %v1554_v53 = vadd.f32 %v1550_v41, %v1544_v45  ;;  %v1536_v54 = vadd.f32 %v1852_v30, %v1535_v47 }
 0x593   : > { %1566 = vst.msk [vmem:[%s2804_s8 + $0x8] sm:$0xf] %vm1563_vm4, %v1561_v48  ;;  %v1559_v6 = vpack.c.bf16 %v1555_v50, %v1555_v50  ;;  %v1558_v55 = vmax.f32 %v1554_v53, 0.0  ;;  %v1552_v56 = vadd.f32 %v1548_v46, %v1536_v54 }
 0x595   : > { %1564 = vst.msk [vmem:[%s2804_s8] sm:$0xf] %vm1563_vm4, %v1559_v6  ;;  %v1562_v3 = vpack.c.bf16 %v1558_v55, %v1558_v55  ;;  %v1556_v51 = vmax.f32 %v1552_v56, 0.0 }
 0x597   : > { %1567 = vst.msk [vmem:[%s2804_s8 + $0xc] sm:$0xf] %vm1563_vm4, %v1562_v3  ;;  %v1560_v57 = vpack.c.bf16 %v1556_v51, %v1556_v51 }
 0x599   : > { %1565 = vst.msk [vmem:[%s2804_s8 + $0x4] sm:$0xf] %vm1563_vm4, %v1560_v57 }
 0x59a   : > { %2270 = shalt.err (!%p2267_p5)
}
 0x59b   : > { %s2271_s8 = scalar_lea.hbm %s3030_s19, 256  ;;  %s2275_s15 = scalar_lea.hbm %s3211_s29, 1024 }
 0x59c   : > { %p2272_p9 = scmp.ne.s32.totalorder %s3030_s19, %s2271_s8  ;;  %p2276_p10 = scmp.lt.s32.totalorder %s3030_s19, %s3211_s29 }
 0x59d   : > { %p2277_p2 = scmp.lt.s32.totalorder %s2275_s15, %s2271_s8 }
 0x59e   : > { %p2273_p1 = pnand %p2272_p9, %p3213_p0 }
 0x59f   : > { %p2278_p3 = por %p2277_p2, %p2276_p10 }
 0x5a0   : > { %p2274_p6 = pneg %p2273_p1 }
 0x5a2   : > { %p2279_p7 = pnand %p2278_p3, %p2274_p6 }
 0x5a4   : > { %2282 = shalt.err (!%p2279_p7)
}
 0x5a5   : > { %s2426_s9 = smov 64   ;;  %s2427_s26 = smov 4  }
 0x5a6   : > { %1968 = dma.vmem_to_hbm [thread:$0]  (%p3213_p0), %s3032_s5, 256, %s3030_s19, %s3040_s0, %s2426_s9, %s2426_s9, %s2427_s26  }
 0x5a7 PF: > { %s3214_s12 = sld [smem:[#allocation17_spill]]  ;;  %p1993_p4 = scmp.ge.s32.totalorder %s2413_s22, 2 }
 0x5a8   : > { %s3215_s6 = sld [smem:[#allocation24_spill]] }
 0x5ad   : > { %s1599_s28 = sand.u32 1, %s3214_s12  }
 0x5ae   : > { %p3216_p11 = scmp.ne.s32.totalorder %s3215_s6, 0  ;;  %s1600_s27 = scalar_lea.sflag [#allocation5], %s1599_s28 }
 0x5b0   : > { %p1985_p8 = pnand %p1993_p4, %p3216_p11 }
 0x5b2   : > { %p1986_p12 = pneg %p1985_p8 }
 0x5b4   : > { %2356 = dma.done.wait (%p1986_p12), %s1600_s27, 256  }
 0x5b5   : > { %2358 = vsyncadd (%p1986_p12), %s1600_s27, 4294967040  ;;  %s29_s22 = sadd.s32 1, %s2413_s22   ;;  %s3218_s7 = sld [smem:[#allocation18_spill]] }
 0x5b6   : > { %p3068_p13 = scmp.ge.s32.totalorder %s29_s22, 6   ;;  %s3219_s5 = sld [smem:[#allocation27_spill]] }
 0x5b7   : > { %s3220_s18 = sld [smem:[#allocation21_spill]]  ;;  %s3225_s10 = smov %s2369_s11 }
 0x5b8   : > { %s3221_s20 = sld [smem:[#allocation25_spill]]  ;;  %s3226_s11 = smov %s2647_s24 }
 0x5b9   : > { %s3222_s0 = sld [smem:[#allocation26_spill]]  ;;  %s3227_s12 = smov %s2377_s13 }
 0x5ba   : > { %s3228_s13 = smov %s2381_s14  ;;  %s3229_s14 = smov %s2672_s25 }
 0x5bb   : > { %s3224_s30 = smov %s3218_s7  ;;  %s3230_s15 = smov %s2389_s16 }
 0x5bc   : > { %s3231_s16 = smov %s2393_s17  ;;  %s3232_s17 = smov %s3219_s5 }
 0x5bd   : > { %s3233_s19 = smov %s2409_s21  ;;  %28 = sbr.rel (!%p3068_p13) target bundleno = 22 (0x16), region = 146 }
 0x5bf   : > { %s3234_s21 = smov %s3222_s0 }
 0x5c2   :  { %1605 = vsyncpa [#allocation4], 1 }
 0x5c3   :  { %1607 = vsyncpa [#allocation4 + $0x1], 1 }
 0x5c4   :  { %1608 = vsyncpa [#allocation7], 1 }
 0x5c5   :  { %1610 = vsyncpa [#allocation7 + $0x1], 1 }
 0x5c6   :  { %1611 = vsyncpa [#allocation10], 1 }
 0x5c7   :  { %1612 = vsyncpa [#allocation5], 1 }
 0x5c8   :  { %1614 = vsyncpa [#allocation5 + $0x1], 1 }

</bundles_post_ra>
